<compile_context>
chip_gen: v5e
topology: v5e:2x2
jax: 0.10.0
libtpu: 0.0.40
codegen_flags: <defaults>
</compile_context>

<pallas_src>
import jax
import jax.numpy as jnp
from jax.experimental import pallas as pl
from jax.experimental.pallas import tpu as pltpu


# ------------------------------ fused kernel ------------------------------- #

def _mynet_kernel(x_ref,                      # (1, 28, 28)   one batch element
                  r1_ref, b1_ref,             # (5, 28, 240), (1, 240)
                  sl1_ref, sr1_ref,           # (2, 12, 24),  (2, 240, 120)
                  r2_ref, b2_ref,             # (5, 120, 160),(1, 160)
                  sl2_ref, sr2_ref,           # (2, 4, 8),    (2, 160, 80)
                  fc1w_ref, fc1b_ref,         # (4, 80, 50),  (1, 50)
                  fc2w_ref, fc2b_ref,         # (50, 10),     (1, 10)
                  o_ref):                     # (1, 1, 10)
    f32 = jnp.float32
    xn = x_ref[0]                                         # (28, 28)

    def pool_relu(y, sl_ref, sr_ref):
        """2x2 max-pool (stride 2) + ReLU via exact 0/1 selection matmuls."""
        r = jnp.maximum(jnp.dot(sl_ref[0], y, preferred_element_type=f32),
                        jnp.dot(sl_ref[1], y, preferred_element_type=f32))
        c = jnp.maximum(jnp.dot(r, sr_ref[0], preferred_element_type=f32),
                        jnp.dot(r, sr_ref[1], preferred_element_type=f32))
        return jnp.maximum(c, 0.0)

    # ---- conv1 (1->10, 5x5 VALID): rows = oh, lanes = co*24 + ow -------- #
    y1 = jnp.zeros((24, 240), f32) + b1_ref[...]
    for di in range(5):
        y1 = y1 + jnp.dot(xn[di:di + 24, :], r1_ref[di],
                          preferred_element_type=f32)
    p1 = pool_relu(y1, sl1_ref, sr1_ref)                  # (12, 120) lanes=ci*12+w

    # ---- conv2 (10->20, 5x5 VALID): rows = oh, lanes = co*8 + ow -------- #
    y2 = jnp.zeros((8, 160), f32) + b2_ref[...]
    for di in range(5):
        y2 = y2 + jnp.dot(p1[di:di + 8, :], r2_ref[di],
                          preferred_element_type=f32)
    p2 = pool_relu(y2, sl2_ref, sr2_ref)                  # (4, 80) lanes=c*4+w

    # ---- fc1 + ReLU (flatten handled as 4 per-row GEMMs) ---------------- #
    z = jnp.zeros((1, 50), f32) + fc1b_ref[...]
    for h in range(4):
        z = z + jnp.dot(p2[h:h + 1, :], fc1w_ref[h], preferred_element_type=f32)
    z = jnp.maximum(z, 0.0)

    # ---- fc2 + log_softmax ---------------------------------------------- #
    logits = jnp.dot(z, fc2w_ref[...], preferred_element_type=f32) + fc2b_ref[...]
    m = jnp.max(logits, axis=-1, keepdims=True)
    s = logits - m
    o_ref[0] = s - jnp.log(jnp.sum(jnp.exp(s), axis=-1, keepdims=True))


# --------------------- host-side operand construction ---------------------- #

def _conv_rhs(w, wi_in):
    """Banded GEMM operand for a VALID conv accumulated over kernel rows.

    w: (Cout, Cin, KH, KW).  Returns R of shape (KH, Cin*wi_in, Cout*wo) with
    R[di, ci*wi_in + wi, co*wo + ow] = w[co, ci, di, wi - ow] if 0 <= wi-ow < KW
    so that  out[oh, co*wo+ow] = sum_di  act[oh+di, :] @ R[di]  is the conv.
    """
    cout, cin, kh, kw = w.shape
    wo = wi_in - kw + 1
    wi = jnp.arange(wi_in)[:, None]
    ow = jnp.arange(wo)[None, :]
    diff = wi - ow                                        # (wi_in, wo)
    valid = (diff >= 0) & (diff < kw)
    dj = jnp.clip(diff, 0, kw - 1)
    g = w[:, :, :, dj]                                    # (Cout, Cin, KH, wi_in, wo)
    g = jnp.where(valid[None, None, None, :, :], g, 0.0)
    g = g.transpose(2, 1, 3, 0, 4)                        # (KH, Cin, wi_in, Cout, wo)
    return g.reshape(kh, cin * wi_in, cout * wo).astype(jnp.float32)


def _row_select(h):
    """(2, h//2, h) with [p, i, 2*i + p] = 1 (even/odd row phase pickers)."""
    i = jnp.arange(h // 2)[:, None]
    r = jnp.arange(h)[None, :]
    return jnp.stack([(r == 2 * i).astype(jnp.float32),
                      (r == 2 * i + 1).astype(jnp.float32)])


def _col_select(c, w_in):
    """(2, c*w_in, c*w_in//2) with [p, ci*w_in + 2*j + p, ci*(w_in//2) + j] = 1."""
    w_out = w_in // 2
    l = jnp.arange(c * w_in)[:, None]
    m = jnp.arange(c * w_out)[None, :]
    tgt = (m // w_out) * w_in + 2 * (m % w_out)
    return jnp.stack([(l == tgt).astype(jnp.float32),
                      (l == tgt + 1).astype(jnp.float32)])


def _full_spec(shape):
    zeros = (0,) * len(shape)
    return pl.BlockSpec(shape, lambda n, _z=zeros: _z)


@jax.jit
def mynet_forward(x, params):
    """x: (N, 1, 28, 28) float32 -> (N, 10) log-probabilities."""
    N = x.shape[0]
    xs = x.reshape(N, 28, 28).astype(jnp.float32)

    r1 = _conv_rhs(params["conv1_w"].astype(jnp.float32), 28)      # (5, 28, 240)
    b1 = jnp.repeat(params["conv1_b"].astype(jnp.float32), 24)[None, :]
    sl1, sr1 = _row_select(24), _col_select(10, 24)
    r2 = _conv_rhs(params["conv2_w"].astype(jnp.float32), 12)      # (5, 120, 160)
    b2 = jnp.repeat(params["conv2_b"].astype(jnp.float32), 8)[None, :]
    sl2, sr2 = _row_select(8), _col_select(20, 8)
    # PyTorch flatten order is (c, h, w); our pooled layout is rows=h, lanes=c*4+w.
    fc1w = (params["fc1_w"].astype(jnp.float32)
            .reshape(20, 4, 4, 50).transpose(1, 0, 2, 3).reshape(4, 80, 50))
    fc1b = params["fc1_b"].astype(jnp.float32)[None, :]
    fc2w = params["fc2_w"].astype(jnp.float32)
    fc2b = params["fc2_b"].astype(jnp.float32)[None, :]

    args = (xs, r1, b1, sl1, sr1, r2, b2, sl2, sr2, fc1w, fc1b, fc2w, fc2b)
    in_specs = [pl.BlockSpec((1, 28, 28), lambda n: (n, 0, 0))]
    in_specs += [_full_spec(a.shape) for a in args[1:]]

    out = pl.pallas_call(
        _mynet_kernel,
        out_shape=jax.ShapeDtypeStruct((N, 1, 10), jnp.float32),
        grid=(N,),
        in_specs=in_specs,
        out_specs=pl.BlockSpec((1, 1, 10), lambda n: (n, 0, 0)),
        compiler_params=pltpu.CompilerParams(
            dimension_semantics=("parallel",)),
    )(*args)
    return out.reshape(N, 10)


# ------------------------------- parameters -------------------------------- #

def init_params(key):
    """Deterministic PyTorch-style uniform(-1/sqrt(fan_in), 1/sqrt(fan_in)) init."""
    ks = jax.random.split(key, 8)

    def u(k, shape, fan_in):
        bound = 1.0 / float(fan_in) ** 0.5
        return jax.random.uniform(k, shape, jnp.float32, -bound, bound)

    return {
        "conv1_w": u(ks[0], (10, 1, 5, 5), 1 * 5 * 5),
        "conv1_b": u(ks[1], (10,), 1 * 5 * 5),
        "conv2_w": u(ks[2], (20, 10, 5, 5), 10 * 5 * 5),
        "conv2_b": u(ks[3], (20,), 10 * 5 * 5),
        "fc1_w": u(ks[4], (320, 50), 320),   # stored as (in, out), in = c*16+h*4+w
        "fc1_b": u(ks[5], (50,), 320),
        "fc2_w": u(ks[6], (50, 10), 50),
        "fc2_b": u(ks[7], (10,), 50),
    }


def reference_forward(x, params):
    """Pure-JAX reference (same math) for a correctness spot-check."""
    def conv(x, w, b):
        y = jax.lax.conv_general_dilated(
            x, w, (1, 1), "VALID", dimension_numbers=("NCHW", "OIHW", "NCHW"))
        return y + b[None, :, None, None]

    def pool_relu(x):
        N, C, H, W = x.shape
        y = x.reshape(N, C, H // 2, 2, W // 2, 2).max(axis=(3, 5))
        return jnp.maximum(y, 0.0)

    y = pool_relu(conv(x, params["conv1_w"], params["conv1_b"]))
    y = pool_relu(conv(y, params["conv2_w"], params["conv2_b"]))
    y = y.reshape(-1, 320)
    y = jnp.maximum(y @ params["fc1_w"] + params["fc1_b"], 0.0)
    y = y @ params["fc2_w"] + params["fc2_b"]
    return jax.nn.log_softmax(y, axis=1)


if __name__ == "__main__":
    key = jax.random.PRNGKey(0)
    k_x, k_p = jax.random.split(key)
    # Input must be 28x28 so the flatten yields 320 features (20 * 4 * 4).
    x = jax.random.normal(k_x, (2, 1, 28, 28), jnp.float32)
    params = init_params(k_p)

    out = jax.block_until_ready(mynet_forward(x, params))
    ref = jax.block_until_ready(reference_forward(x, params))

    assert out.shape == (2, 10), out.shape
    # Tolerance allows for MXU multi-pass f32 rounding differences vs XLA.
    err = float(jnp.max(jnp.abs(out - ref)))
    assert jnp.allclose(out, ref, atol=1e-3, rtol=1e-3), f"mismatch vs reference (max abs err {err})"
    print("KERNEL_OK")
</pallas_src>

<mosaic_0001>
module attributes {stable_mosaic.version = 11 : i64} {
  func.func @_mynet_kernel(%arg0: i32, %arg1: memref<1x28x28xf32, #tpu.memory_space<vmem>>, %arg2: memref<5x28x240xf32, #tpu.memory_space<vmem>>, %arg3: memref<1x240xf32, #tpu.memory_space<vmem>>, %arg4: memref<2x12x24xf32, #tpu.memory_space<vmem>>, %arg5: memref<2x240x120xf32, #tpu.memory_space<vmem>>, %arg6: memref<5x120x160xf32, #tpu.memory_space<vmem>>, %arg7: memref<1x160xf32, #tpu.memory_space<vmem>>, %arg8: memref<2x4x8xf32, #tpu.memory_space<vmem>>, %arg9: memref<2x160x80xf32, #tpu.memory_space<vmem>>, %arg10: memref<4x80x50xf32, #tpu.memory_space<vmem>>, %arg11: memref<1x50xf32, #tpu.memory_space<vmem>>, %arg12: memref<50x10xf32, #tpu.memory_space<vmem>>, %arg13: memref<1x10xf32, #tpu.memory_space<vmem>>, %arg14: memref<1x1x10xf32, #tpu.memory_space<vmem>>) attributes {dimension_semantics = [#tpu.dimension_semantics<parallel>], iteration_bounds = array<i64: 2>, scalar_prefetch = 0 : i64, scratch_operands = 0 : i64, tpu.core_type = #tpu.core_type<tc>, window_params = [{transform_indices = @transform_0, window_bounds = array<i64: 1, 28, 28>}, {pipeline_mode = #tpu.pipeline_mode<synchronous>, transform_indices = @transform_1, window_bounds = array<i64: 5, 28, 240>}, {pipeline_mode = #tpu.pipeline_mode<synchronous>, transform_indices = @transform_2, window_bounds = array<i64: 1, 240>}, {pipeline_mode = #tpu.pipeline_mode<synchronous>, transform_indices = @transform_3, window_bounds = array<i64: 2, 12, 24>}, {pipeline_mode = #tpu.pipeline_mode<synchronous>, transform_indices = @transform_4, window_bounds = array<i64: 2, 240, 120>}, {pipeline_mode = #tpu.pipeline_mode<synchronous>, transform_indices = @transform_5, window_bounds = array<i64: 5, 120, 160>}, {pipeline_mode = #tpu.pipeline_mode<synchronous>, transform_indices = @transform_6, window_bounds = array<i64: 1, 160>}, {pipeline_mode = #tpu.pipeline_mode<synchronous>, transform_indices = @transform_7, window_bounds = array<i64: 2, 4, 8>}, {pipeline_mode = #tpu.pipeline_mode<synchronous>, transform_indices = @transform_8, window_bounds = array<i64: 2, 160, 80>}, {pipeline_mode = #tpu.pipeline_mode<synchronous>, transform_indices = @transform_9, window_bounds = array<i64: 4, 80, 50>}, {pipeline_mode = #tpu.pipeline_mode<synchronous>, transform_indices = @transform_10, window_bounds = array<i64: 1, 50>}, {pipeline_mode = #tpu.pipeline_mode<synchronous>, transform_indices = @transform_11, window_bounds = array<i64: 50, 10>}, {pipeline_mode = #tpu.pipeline_mode<synchronous>, transform_indices = @transform_12, window_bounds = array<i64: 1, 10>}, {transform_indices = @transform_13, window_bounds = array<i64: 1, 1, 10>}]} {
    %c0 = arith.constant 0 : index
    %c0_0 = arith.constant 0 : index
    %c0_1 = arith.constant 0 : index
    %0 = vector.load %arg1[%c0, %c0_0, %c0_1] : memref<1x28x28xf32, #tpu.memory_space<vmem>>, vector<1x28x28xf32>
    %1 = vector.shape_cast %0 : vector<1x28x28xf32> to vector<28x28xf32>
    %cst = arith.constant 0.000000e+00 : f32
    %2 = vector.broadcast %cst : f32 to vector<24x240xf32>
    %c0_2 = arith.constant 0 : index
    %c0_3 = arith.constant 0 : index
    %3 = vector.load %arg3[%c0_2, %c0_3] : memref<1x240xf32, #tpu.memory_space<vmem>>, vector<1x240xf32>
    %4 = vector.broadcast %3 : vector<1x240xf32> to vector<24x240xf32>
    %5 = arith.addf %2, %4 : vector<24x240xf32>
    %6 = vector.extract_strided_slice %1 {offsets = [0, 0], sizes = [24, 28], strides = [1, 1]} : vector<28x28xf32> to vector<24x28xf32>
    %c0_4 = arith.constant 0 : index
    %c0_5 = arith.constant 0 : index
    %c0_6 = arith.constant 0 : index
    %7 = vector.load %arg2[%c0_4, %c0_5, %c0_6] : memref<5x28x240xf32, #tpu.memory_space<vmem>>, vector<1x28x240xf32>
    %8 = vector.shape_cast %7 : vector<1x28x240xf32> to vector<28x240xf32>
    %cst_7 = arith.constant dense<0.000000e+00> : vector<24x240xf32>
    %9 = tpu.matmul %6, %8, %cst_7 {dimension_numbers = #tpu.dot_dimension_numbers<[1], [0], [0], [1], [0, 0, 1, 1], [], []>} : vector<24x28xf32>, vector<28x240xf32>, vector<24x240xf32> -> vector<24x240xf32>
    %10 = arith.addf %5, %9 : vector<24x240xf32>
    %11 = vector.extract_strided_slice %1 {offsets = [1, 0], sizes = [24, 28], strides = [1, 1]} : vector<28x28xf32> to vector<24x28xf32>
    %c1 = arith.constant 1 : index
    %c0_8 = arith.constant 0 : index
    %c0_9 = arith.constant 0 : index
    %12 = vector.load %arg2[%c1, %c0_8, %c0_9] : memref<5x28x240xf32, #tpu.memory_space<vmem>>, vector<1x28x240xf32>
    %13 = vector.shape_cast %12 : vector<1x28x240xf32> to vector<28x240xf32>
    %cst_10 = arith.constant dense<0.000000e+00> : vector<24x240xf32>
    %14 = tpu.matmul %11, %13, %cst_10 {dimension_numbers = #tpu.dot_dimension_numbers<[1], [0], [0], [1], [0, 0, 1, 1], [], []>} : vector<24x28xf32>, vector<28x240xf32>, vector<24x240xf32> -> vector<24x240xf32>
    %15 = arith.addf %10, %14 : vector<24x240xf32>
    %16 = vector.extract_strided_slice %1 {offsets = [2, 0], sizes = [24, 28], strides = [1, 1]} : vector<28x28xf32> to vector<24x28xf32>
    %c2 = arith.constant 2 : index
    %c0_11 = arith.constant 0 : index
    %c0_12 = arith.constant 0 : index
    %17 = vector.load %arg2[%c2, %c0_11, %c0_12] : memref<5x28x240xf32, #tpu.memory_space<vmem>>, vector<1x28x240xf32>
    %18 = vector.shape_cast %17 : vector<1x28x240xf32> to vector<28x240xf32>
    %cst_13 = arith.constant dense<0.000000e+00> : vector<24x240xf32>
    %19 = tpu.matmul %16, %18, %cst_13 {dimension_numbers = #tpu.dot_dimension_numbers<[1], [0], [0], [1], [0, 0, 1, 1], [], []>} : vector<24x28xf32>, vector<28x240xf32>, vector<24x240xf32> -> vector<24x240xf32>
    %20 = arith.addf %15, %19 : vector<24x240xf32>
    %21 = vector.extract_strided_slice %1 {offsets = [3, 0], sizes = [24, 28], strides = [1, 1]} : vector<28x28xf32> to vector<24x28xf32>
    %c3 = arith.constant 3 : index
    %c0_14 = arith.constant 0 : index
    %c0_15 = arith.constant 0 : index
    %22 = vector.load %arg2[%c3, %c0_14, %c0_15] : memref<5x28x240xf32, #tpu.memory_space<vmem>>, vector<1x28x240xf32>
    %23 = vector.shape_cast %22 : vector<1x28x240xf32> to vector<28x240xf32>
    %cst_16 = arith.constant dense<0.000000e+00> : vector<24x240xf32>
    %24 = tpu.matmul %21, %23, %cst_16 {dimension_numbers = #tpu.dot_dimension_numbers<[1], [0], [0], [1], [0, 0, 1, 1], [], []>} : vector<24x28xf32>, vector<28x240xf32>, vector<24x240xf32> -> vector<24x240xf32>
    %25 = arith.addf %20, %24 : vector<24x240xf32>
    %26 = vector.extract_strided_slice %1 {offsets = [4, 0], sizes = [24, 28], strides = [1, 1]} : vector<28x28xf32> to vector<24x28xf32>
    %c4 = arith.constant 4 : index
    %c0_17 = arith.constant 0 : index
    %c0_18 = arith.constant 0 : index
    %27 = vector.load %arg2[%c4, %c0_17, %c0_18] : memref<5x28x240xf32, #tpu.memory_space<vmem>>, vector<1x28x240xf32>
    %28 = vector.shape_cast %27 : vector<1x28x240xf32> to vector<28x240xf32>
    %cst_19 = arith.constant dense<0.000000e+00> : vector<24x240xf32>
    %29 = tpu.matmul %26, %28, %cst_19 {dimension_numbers = #tpu.dot_dimension_numbers<[1], [0], [0], [1], [0, 0, 1, 1], [], []>} : vector<24x28xf32>, vector<28x240xf32>, vector<24x240xf32> -> vector<24x240xf32>
    %30 = arith.addf %25, %29 : vector<24x240xf32>
    %c0_20 = arith.constant 0 : index
    %c0_21 = arith.constant 0 : index
    %c0_22 = arith.constant 0 : index
    %31 = vector.load %arg4[%c0_20, %c0_21, %c0_22] : memref<2x12x24xf32, #tpu.memory_space<vmem>>, vector<1x12x24xf32>
    %32 = vector.shape_cast %31 : vector<1x12x24xf32> to vector<12x24xf32>
    %cst_23 = arith.constant dense<0.000000e+00> : vector<12x240xf32>
    %33 = tpu.matmul %32, %30, %cst_23 {dimension_numbers = #tpu.dot_dimension_numbers<[1], [0], [0], [1], [0, 0, 1, 1], [], []>} : vector<12x24xf32>, vector<24x240xf32>, vector<12x240xf32> -> vector<12x240xf32>
    %c1_24 = arith.constant 1 : index
    %c0_25 = arith.constant 0 : index
    %c0_26 = arith.constant 0 : index
    %34 = vector.load %arg4[%c1_24, %c0_25, %c0_26] : memref<2x12x24xf32, #tpu.memory_space<vmem>>, vector<1x12x24xf32>
    %35 = vector.shape_cast %34 : vector<1x12x24xf32> to vector<12x24xf32>
    %cst_27 = arith.constant dense<0.000000e+00> : vector<12x240xf32>
    %36 = tpu.matmul %35, %30, %cst_27 {dimension_numbers = #tpu.dot_dimension_numbers<[1], [0], [0], [1], [0, 0, 1, 1], [], []>} : vector<12x24xf32>, vector<24x240xf32>, vector<12x240xf32> -> vector<12x240xf32>
    %37 = arith.maximumf %33, %36 : vector<12x240xf32>
    %c0_28 = arith.constant 0 : index
    %c0_29 = arith.constant 0 : index
    %c0_30 = arith.constant 0 : index
    %38 = vector.load %arg5[%c0_28, %c0_29, %c0_30] : memref<2x240x120xf32, #tpu.memory_space<vmem>>, vector<1x240x120xf32>
    %39 = vector.shape_cast %38 : vector<1x240x120xf32> to vector<240x120xf32>
    %cst_31 = arith.constant dense<0.000000e+00> : vector<12x120xf32>
    %40 = tpu.matmul %37, %39, %cst_31 {dimension_numbers = #tpu.dot_dimension_numbers<[1], [0], [0], [1], [0, 0, 1, 1], [], []>} : vector<12x240xf32>, vector<240x120xf32>, vector<12x120xf32> -> vector<12x120xf32>
    %c1_32 = arith.constant 1 : index
    %c0_33 = arith.constant 0 : index
    %c0_34 = arith.constant 0 : index
    %41 = vector.load %arg5[%c1_32, %c0_33, %c0_34] : memref<2x240x120xf32, #tpu.memory_space<vmem>>, vector<1x240x120xf32>
    %42 = vector.shape_cast %41 : vector<1x240x120xf32> to vector<240x120xf32>
    %cst_35 = arith.constant dense<0.000000e+00> : vector<12x120xf32>
    %43 = tpu.matmul %37, %42, %cst_35 {dimension_numbers = #tpu.dot_dimension_numbers<[1], [0], [0], [1], [0, 0, 1, 1], [], []>} : vector<12x240xf32>, vector<240x120xf32>, vector<12x120xf32> -> vector<12x120xf32>
    %44 = arith.maximumf %40, %43 : vector<12x120xf32>
    %cst_36 = arith.constant 0.000000e+00 : f32
    %45 = vector.broadcast %cst_36 : f32 to vector<12x120xf32>
    %46 = arith.maximumf %44, %45 : vector<12x120xf32>
    %cst_37 = arith.constant 0.000000e+00 : f32
    %47 = vector.broadcast %cst_37 : f32 to vector<8x160xf32>
    %c0_38 = arith.constant 0 : index
    %c0_39 = arith.constant 0 : index
    %48 = vector.load %arg7[%c0_38, %c0_39] : memref<1x160xf32, #tpu.memory_space<vmem>>, vector<1x160xf32>
    %49 = vector.broadcast %48 : vector<1x160xf32> to vector<8x160xf32>
    %50 = arith.addf %47, %49 : vector<8x160xf32>
    %51 = vector.extract_strided_slice %46 {offsets = [0, 0], sizes = [8, 120], strides = [1, 1]} : vector<12x120xf32> to vector<8x120xf32>
    %c0_40 = arith.constant 0 : index
    %c0_41 = arith.constant 0 : index
    %c0_42 = arith.constant 0 : index
    %52 = vector.load %arg6[%c0_40, %c0_41, %c0_42] : memref<5x120x160xf32, #tpu.memory_space<vmem>>, vector<1x120x160xf32>
    %53 = vector.shape_cast %52 : vector<1x120x160xf32> to vector<120x160xf32>
    %cst_43 = arith.constant dense<0.000000e+00> : vector<8x160xf32>
    %54 = tpu.matmul %51, %53, %cst_43 {dimension_numbers = #tpu.dot_dimension_numbers<[1], [0], [0], [1], [0, 0, 1, 1], [], []>} : vector<8x120xf32>, vector<120x160xf32>, vector<8x160xf32> -> vector<8x160xf32>
    %55 = arith.addf %50, %54 : vector<8x160xf32>
    %56 = vector.extract_strided_slice %46 {offsets = [1, 0], sizes = [8, 120], strides = [1, 1]} : vector<12x120xf32> to vector<8x120xf32>
    %c1_44 = arith.constant 1 : index
    %c0_45 = arith.constant 0 : index
    %c0_46 = arith.constant 0 : index
    %57 = vector.load %arg6[%c1_44, %c0_45, %c0_46] : memref<5x120x160xf32, #tpu.memory_space<vmem>>, vector<1x120x160xf32>
    %58 = vector.shape_cast %57 : vector<1x120x160xf32> to vector<120x160xf32>
    %cst_47 = arith.constant dense<0.000000e+00> : vector<8x160xf32>
    %59 = tpu.matmul %56, %58, %cst_47 {dimension_numbers = #tpu.dot_dimension_numbers<[1], [0], [0], [1], [0, 0, 1, 1], [], []>} : vector<8x120xf32>, vector<120x160xf32>, vector<8x160xf32> -> vector<8x160xf32>
    %60 = arith.addf %55, %59 : vector<8x160xf32>
    %61 = vector.extract_strided_slice %46 {offsets = [2, 0], sizes = [8, 120], strides = [1, 1]} : vector<12x120xf32> to vector<8x120xf32>
    %c2_48 = arith.constant 2 : index
    %c0_49 = arith.constant 0 : index
    %c0_50 = arith.constant 0 : index
    %62 = vector.load %arg6[%c2_48, %c0_49, %c0_50] : memref<5x120x160xf32, #tpu.memory_space<vmem>>, vector<1x120x160xf32>
    %63 = vector.shape_cast %62 : vector<1x120x160xf32> to vector<120x160xf32>
    %cst_51 = arith.constant dense<0.000000e+00> : vector<8x160xf32>
    %64 = tpu.matmul %61, %63, %cst_51 {dimension_numbers = #tpu.dot_dimension_numbers<[1], [0], [0], [1], [0, 0, 1, 1], [], []>} : vector<8x120xf32>, vector<120x160xf32>, vector<8x160xf32> -> vector<8x160xf32>
    %65 = arith.addf %60, %64 : vector<8x160xf32>
    %66 = vector.extract_strided_slice %46 {offsets = [3, 0], sizes = [8, 120], strides = [1, 1]} : vector<12x120xf32> to vector<8x120xf32>
    %c3_52 = arith.constant 3 : index
    %c0_53 = arith.constant 0 : index
    %c0_54 = arith.constant 0 : index
    %67 = vector.load %arg6[%c3_52, %c0_53, %c0_54] : memref<5x120x160xf32, #tpu.memory_space<vmem>>, vector<1x120x160xf32>
    %68 = vector.shape_cast %67 : vector<1x120x160xf32> to vector<120x160xf32>
    %cst_55 = arith.constant dense<0.000000e+00> : vector<8x160xf32>
    %69 = tpu.matmul %66, %68, %cst_55 {dimension_numbers = #tpu.dot_dimension_numbers<[1], [0], [0], [1], [0, 0, 1, 1], [], []>} : vector<8x120xf32>, vector<120x160xf32>, vector<8x160xf32> -> vector<8x160xf32>
    %70 = arith.addf %65, %69 : vector<8x160xf32>
    %71 = vector.extract_strided_slice %46 {offsets = [4, 0], sizes = [8, 120], strides = [1, 1]} : vector<12x120xf32> to vector<8x120xf32>
    %c4_56 = arith.constant 4 : index
    %c0_57 = arith.constant 0 : index
    %c0_58 = arith.constant 0 : index
    %72 = vector.load %arg6[%c4_56, %c0_57, %c0_58] : memref<5x120x160xf32, #tpu.memory_space<vmem>>, vector<1x120x160xf32>
    %73 = vector.shape_cast %72 : vector<1x120x160xf32> to vector<120x160xf32>
    %cst_59 = arith.constant dense<0.000000e+00> : vector<8x160xf32>
    %74 = tpu.matmul %71, %73, %cst_59 {dimension_numbers = #tpu.dot_dimension_numbers<[1], [0], [0], [1], [0, 0, 1, 1], [], []>} : vector<8x120xf32>, vector<120x160xf32>, vector<8x160xf32> -> vector<8x160xf32>
    %75 = arith.addf %70, %74 : vector<8x160xf32>
    %c0_60 = arith.constant 0 : index
    %c0_61 = arith.constant 0 : index
    %c0_62 = arith.constant 0 : index
    %76 = vector.load %arg8[%c0_60, %c0_61, %c0_62] : memref<2x4x8xf32, #tpu.memory_space<vmem>>, vector<1x4x8xf32>
    %77 = vector.shape_cast %76 : vector<1x4x8xf32> to vector<4x8xf32>
    %cst_63 = arith.constant dense<0.000000e+00> : vector<4x160xf32>
    %78 = tpu.matmul %77, %75, %cst_63 {dimension_numbers = #tpu.dot_dimension_numbers<[1], [0], [0], [1], [0, 0, 1, 1], [], []>} : vector<4x8xf32>, vector<8x160xf32>, vector<4x160xf32> -> vector<4x160xf32>
    %c1_64 = arith.constant 1 : index
    %c0_65 = arith.constant 0 : index
    %c0_66 = arith.constant 0 : index
    %79 = vector.load %arg8[%c1_64, %c0_65, %c0_66] : memref<2x4x8xf32, #tpu.memory_space<vmem>>, vector<1x4x8xf32>
    %80 = vector.shape_cast %79 : vector<1x4x8xf32> to vector<4x8xf32>
    %cst_67 = arith.constant dense<0.000000e+00> : vector<4x160xf32>
    %81 = tpu.matmul %80, %75, %cst_67 {dimension_numbers = #tpu.dot_dimension_numbers<[1], [0], [0], [1], [0, 0, 1, 1], [], []>} : vector<4x8xf32>, vector<8x160xf32>, vector<4x160xf32> -> vector<4x160xf32>
    %82 = arith.maximumf %78, %81 : vector<4x160xf32>
    %c0_68 = arith.constant 0 : index
    %c0_69 = arith.constant 0 : index
    %c0_70 = arith.constant 0 : index
    %83 = vector.load %arg9[%c0_68, %c0_69, %c0_70] : memref<2x160x80xf32, #tpu.memory_space<vmem>>, vector<1x160x80xf32>
    %84 = vector.shape_cast %83 : vector<1x160x80xf32> to vector<160x80xf32>
    %cst_71 = arith.constant dense<0.000000e+00> : vector<4x80xf32>
    %85 = tpu.matmul %82, %84, %cst_71 {dimension_numbers = #tpu.dot_dimension_numbers<[1], [0], [0], [1], [0, 0, 1, 1], [], []>} : vector<4x160xf32>, vector<160x80xf32>, vector<4x80xf32> -> vector<4x80xf32>
    %c1_72 = arith.constant 1 : index
    %c0_73 = arith.constant 0 : index
    %c0_74 = arith.constant 0 : index
    %86 = vector.load %arg9[%c1_72, %c0_73, %c0_74] : memref<2x160x80xf32, #tpu.memory_space<vmem>>, vector<1x160x80xf32>
    %87 = vector.shape_cast %86 : vector<1x160x80xf32> to vector<160x80xf32>
    %cst_75 = arith.constant dense<0.000000e+00> : vector<4x80xf32>
    %88 = tpu.matmul %82, %87, %cst_75 {dimension_numbers = #tpu.dot_dimension_numbers<[1], [0], [0], [1], [0, 0, 1, 1], [], []>} : vector<4x160xf32>, vector<160x80xf32>, vector<4x80xf32> -> vector<4x80xf32>
    %89 = arith.maximumf %85, %88 : vector<4x80xf32>
    %cst_76 = arith.constant 0.000000e+00 : f32
    %90 = vector.broadcast %cst_76 : f32 to vector<4x80xf32>
    %91 = arith.maximumf %89, %90 : vector<4x80xf32>
    %cst_77 = arith.constant 0.000000e+00 : f32
    %92 = vector.broadcast %cst_77 : f32 to vector<1x50xf32>
    %c0_78 = arith.constant 0 : index
    %c0_79 = arith.constant 0 : index
    %93 = vector.load %arg11[%c0_78, %c0_79] : memref<1x50xf32, #tpu.memory_space<vmem>>, vector<1x50xf32>
    %94 = arith.addf %92, %93 : vector<1x50xf32>
    %95 = vector.extract_strided_slice %91 {offsets = [0, 0], sizes = [1, 80], strides = [1, 1]} : vector<4x80xf32> to vector<1x80xf32>
    %c0_80 = arith.constant 0 : index
    %c0_81 = arith.constant 0 : index
    %c0_82 = arith.constant 0 : index
    %96 = vector.load %arg10[%c0_80, %c0_81, %c0_82] : memref<4x80x50xf32, #tpu.memory_space<vmem>>, vector<1x80x50xf32>
    %97 = vector.shape_cast %96 : vector<1x80x50xf32> to vector<80x50xf32>
    %cst_83 = arith.constant dense<0.000000e+00> : vector<1x50xf32>
    %98 = tpu.matmul %95, %97, %cst_83 {dimension_numbers = #tpu.dot_dimension_numbers<[1], [0], [0], [1], [0, 0, 1, 1], [], []>} : vector<1x80xf32>, vector<80x50xf32>, vector<1x50xf32> -> vector<1x50xf32>
    %99 = arith.addf %94, %98 : vector<1x50xf32>
    %100 = vector.extract_strided_slice %91 {offsets = [1, 0], sizes = [1, 80], strides = [1, 1]} : vector<4x80xf32> to vector<1x80xf32>
    %c1_84 = arith.constant 1 : index
    %c0_85 = arith.constant 0 : index
    %c0_86 = arith.constant 0 : index
    %101 = vector.load %arg10[%c1_84, %c0_85, %c0_86] : memref<4x80x50xf32, #tpu.memory_space<vmem>>, vector<1x80x50xf32>
    %102 = vector.shape_cast %101 : vector<1x80x50xf32> to vector<80x50xf32>
    %cst_87 = arith.constant dense<0.000000e+00> : vector<1x50xf32>
    %103 = tpu.matmul %100, %102, %cst_87 {dimension_numbers = #tpu.dot_dimension_numbers<[1], [0], [0], [1], [0, 0, 1, 1], [], []>} : vector<1x80xf32>, vector<80x50xf32>, vector<1x50xf32> -> vector<1x50xf32>
    %104 = arith.addf %99, %103 : vector<1x50xf32>
    %105 = vector.extract_strided_slice %91 {offsets = [2, 0], sizes = [1, 80], strides = [1, 1]} : vector<4x80xf32> to vector<1x80xf32>
    %c2_88 = arith.constant 2 : index
    %c0_89 = arith.constant 0 : index
    %c0_90 = arith.constant 0 : index
    %106 = vector.load %arg10[%c2_88, %c0_89, %c0_90] : memref<4x80x50xf32, #tpu.memory_space<vmem>>, vector<1x80x50xf32>
    %107 = vector.shape_cast %106 : vector<1x80x50xf32> to vector<80x50xf32>
    %cst_91 = arith.constant dense<0.000000e+00> : vector<1x50xf32>
    %108 = tpu.matmul %105, %107, %cst_91 {dimension_numbers = #tpu.dot_dimension_numbers<[1], [0], [0], [1], [0, 0, 1, 1], [], []>} : vector<1x80xf32>, vector<80x50xf32>, vector<1x50xf32> -> vector<1x50xf32>
    %109 = arith.addf %104, %108 : vector<1x50xf32>
    %110 = vector.extract_strided_slice %91 {offsets = [3, 0], sizes = [1, 80], strides = [1, 1]} : vector<4x80xf32> to vector<1x80xf32>
    %c3_92 = arith.constant 3 : index
    %c0_93 = arith.constant 0 : index
    %c0_94 = arith.constant 0 : index
    %111 = vector.load %arg10[%c3_92, %c0_93, %c0_94] : memref<4x80x50xf32, #tpu.memory_space<vmem>>, vector<1x80x50xf32>
    %112 = vector.shape_cast %111 : vector<1x80x50xf32> to vector<80x50xf32>
    %cst_95 = arith.constant dense<0.000000e+00> : vector<1x50xf32>
    %113 = tpu.matmul %110, %112, %cst_95 {dimension_numbers = #tpu.dot_dimension_numbers<[1], [0], [0], [1], [0, 0, 1, 1], [], []>} : vector<1x80xf32>, vector<80x50xf32>, vector<1x50xf32> -> vector<1x50xf32>
    %114 = arith.addf %109, %113 : vector<1x50xf32>
    %cst_96 = arith.constant 0.000000e+00 : f32
    %115 = vector.broadcast %cst_96 : f32 to vector<1x50xf32>
    %116 = arith.maximumf %114, %115 : vector<1x50xf32>
    %c0_97 = arith.constant 0 : index
    %c0_98 = arith.constant 0 : index
    %117 = vector.load %arg12[%c0_97, %c0_98] : memref<50x10xf32, #tpu.memory_space<vmem>>, vector<50x10xf32>
    %cst_99 = arith.constant dense<0.000000e+00> : vector<1x10xf32>
    %118 = tpu.matmul %116, %117, %cst_99 {dimension_numbers = #tpu.dot_dimension_numbers<[1], [0], [0], [1], [0, 0, 1, 1], [], []>} : vector<1x50xf32>, vector<50x10xf32>, vector<1x10xf32> -> vector<1x10xf32>
    %c0_100 = arith.constant 0 : index
    %c0_101 = arith.constant 0 : index
    %119 = vector.load %arg13[%c0_100, %c0_101] : memref<1x10xf32, #tpu.memory_space<vmem>>, vector<1x10xf32>
    %120 = arith.addf %118, %119 : vector<1x10xf32>
    %cst_102 = arith.constant dense<0xFF800000> : vector<1xf32>
    %121 = vector.multi_reduction <maximumf>, %120, %cst_102 [1] : vector<1x10xf32> to vector<1xf32>
    %122 = vector.shape_cast %121 : vector<1xf32> to vector<1x1xf32>
    %123 = vector.broadcast %122 : vector<1x1xf32> to vector<1x10xf32>
    %124 = arith.subf %120, %123 : vector<1x10xf32>
    %125 = math.exp %124 : vector<1x10xf32>
    %cst_103 = arith.constant dense<0.000000e+00> : vector<1xf32>
    %126 = vector.multi_reduction <add>, %125, %cst_103 [1] : vector<1x10xf32> to vector<1xf32>
    %127 = vector.shape_cast %126 : vector<1xf32> to vector<1x1xf32>
    %128 = math.log %127 : vector<1x1xf32>
    %129 = vector.broadcast %128 : vector<1x1xf32> to vector<1x10xf32>
    %130 = arith.subf %124, %129 : vector<1x10xf32>
    %c0_104 = arith.constant 0 : index
    %c0_105 = arith.constant 0 : index
    %c0_106 = arith.constant 0 : index
    %131 = vector.load %arg14[%c0_104, %c0_105, %c0_106] : memref<1x1x10xf32, #tpu.memory_space<vmem>>, vector<1x1x10xf32>
    %132 = vector.shape_cast %131 : vector<1x1x10xf32> to vector<1x10xf32>
    %133 = vector.shape_cast %130 : vector<1x10xf32> to vector<1x1x10xf32>
    tpu.vector_store %arg14[%c0_104, %c0_105, %c0_106], %133 {strides = array<i32>} : memref<1x1x10xf32, #tpu.memory_space<vmem>>, vector<1x1x10xf32>,
    return
  }
  func.func @transform_0(%arg0: i32) -> (i32, i32, i32) {
    %c0_i32 = arith.constant 0 : i32
    %c0_i32_0 = arith.constant 0 : i32
    %c0_i32_1 = arith.constant 0 : i32
    return %arg0, %c0_i32, %c0_i32_0 : i32, i32, i32
  }
  func.func @transform_1(%arg0: i32) -> (i32, i32, i32) {
    %c0_i32 = arith.constant 0 : i32
    %c0_i32_0 = arith.constant 0 : i32
    %c0_i32_1 = arith.constant 0 : i32
    %c0_i32_2 = arith.constant 0 : i32
    return %c0_i32, %c0_i32_0, %c0_i32_1 : i32, i32, i32
  }
  func.func @transform_2(%arg0: i32) -> (i32, i32) {
    %c0_i32 = arith.constant 0 : i32
    %c0_i32_0 = arith.constant 0 : i32
    %c0_i32_1 = arith.constant 0 : i32
    return %c0_i32, %c0_i32_0 : i32, i32
  }
  func.func @transform_3(%arg0: i32) -> (i32, i32, i32) {
    %c0_i32 = arith.constant 0 : i32
    %c0_i32_0 = arith.constant 0 : i32
    %c0_i32_1 = arith.constant 0 : i32
    %c0_i32_2 = arith.constant 0 : i32
    return %c0_i32, %c0_i32_0, %c0_i32_1 : i32, i32, i32
  }
  func.func @transform_4(%arg0: i32) -> (i32, i32, i32) {
    %c0_i32 = arith.constant 0 : i32
    %c0_i32_0 = arith.constant 0 : i32
    %c0_i32_1 = arith.constant 0 : i32
    %c0_i32_2 = arith.constant 0 : i32
    return %c0_i32, %c0_i32_0, %c0_i32_1 : i32, i32, i32
  }
  func.func @transform_5(%arg0: i32) -> (i32, i32, i32) {
    %c0_i32 = arith.constant 0 : i32
    %c0_i32_0 = arith.constant 0 : i32
    %c0_i32_1 = arith.constant 0 : i32
    %c0_i32_2 = arith.constant 0 : i32
    return %c0_i32, %c0_i32_0, %c0_i32_1 : i32, i32, i32
  }
  func.func @transform_6(%arg0: i32) -> (i32, i32) {
    %c0_i32 = arith.constant 0 : i32
    %c0_i32_0 = arith.constant 0 : i32
    %c0_i32_1 = arith.constant 0 : i32
    return %c0_i32, %c0_i32_0 : i32, i32
  }
  func.func @transform_7(%arg0: i32) -> (i32, i32, i32) {
    %c0_i32 = arith.constant 0 : i32
    %c0_i32_0 = arith.constant 0 : i32
    %c0_i32_1 = arith.constant 0 : i32
    %c0_i32_2 = arith.constant 0 : i32
    return %c0_i32, %c0_i32_0, %c0_i32_1 : i32, i32, i32
  }
  func.func @transform_8(%arg0: i32) -> (i32, i32, i32) {
    %c0_i32 = arith.constant 0 : i32
    %c0_i32_0 = arith.constant 0 : i32
    %c0_i32_1 = arith.constant 0 : i32
    %c0_i32_2 = arith.constant 0 : i32
    return %c0_i32, %c0_i32_0, %c0_i32_1 : i32, i32, i32
  }
  func.func @transform_9(%arg0: i32) -> (i32, i32, i32) {
    %c0_i32 = arith.constant 0 : i32
    %c0_i32_0 = arith.constant 0 : i32
    %c0_i32_1 = arith.constant 0 : i32
    %c0_i32_2 = arith.constant 0 : i32
    return %c0_i32, %c0_i32_0, %c0_i32_1 : i32, i32, i32
  }
  func.func @transform_10(%arg0: i32) -> (i32, i32) {
    %c0_i32 = arith.constant 0 : i32
    %c0_i32_0 = arith.constant 0 : i32
    %c0_i32_1 = arith.constant 0 : i32
    return %c0_i32, %c0_i32_0 : i32, i32
  }
  func.func @transform_11(%arg0: i32) -> (i32, i32) {
    %c0_i32 = arith.constant 0 : i32
    %c0_i32_0 = arith.constant 0 : i32
    %c0_i32_1 = arith.constant 0 : i32
    return %c0_i32, %c0_i32_0 : i32, i32
  }
  func.func @transform_12(%arg0: i32) -> (i32, i32) {
    %c0_i32 = arith.constant 0 : i32
    %c0_i32_0 = arith.constant 0 : i32
    %c0_i32_1 = arith.constant 0 : i32
    return %c0_i32, %c0_i32_0 : i32, i32
  }
  func.func @transform_13(%arg0: i32) -> (i32, i32, i32) {
    %c0_i32 = arith.constant 0 : i32
    %c0_i32_0 = arith.constant 0 : i32
    %c0_i32_1 = arith.constant 0 : i32
    return %arg0, %c0_i32, %c0_i32_0 : i32, i32, i32
  }
}

</mosaic_0001>

<bundles_post_ra>
// kernel: mynet_forward.1
= control target key start
LH: loop header
LB: loop body
LE: loop exit
PB: predicated region body
PF: predicated region fallthrough
CT: control target
= control target key end

     0   :  { %18 = vsyncpa [#allocation3], 0  ;;  %s3800_s0 = inlined_call_operand.vmem [shape: f32[2,28,28], index: 0, kind: input, shape index: {}]   ;;  %s3801_s1 = inlined_call_operand.vmem [shape: f32[5,28,240], index: 1, kind: input, shape index: {}]   ;;  %s3802_s2 = inlined_call_operand.vmem [shape: f32[1,240], index: 2, kind: input, shape index: {}]   ;;  %s3803_s3 = inlined_call_operand.vmem [shape: f32[2,12,24], index: 3, kind: input, shape index: {}]   ;;  %s3804_s4 = inlined_call_operand.vmem [shape: f32[2,240,120], index: 4, kind: input, shape index: {}]   ;;  %s3805_s5 = inlined_call_operand.vmem [shape: f32[5,120,160], index: 5, kind: input, shape index: {}]   ;;  %s3806_s6 = inlined_call_operand.vmem [shape: f32[1,160], index: 6, kind: input, shape index: {}]   ;;  %s3807_s7 = inlined_call_operand.vmem [shape: f32[2,4,8], index: 7, kind: input, shape index: {}]   ;;  %s3808_s8 = inlined_call_operand.vmem [shape: f32[2,160,80], index: 8, kind: input, shape index: {}]   ;;  %s3809_s9 = inlined_call_operand.vmem [shape: f32[4,80,50], index: 9, kind: input, shape index: {}]   ;;  %s3810_s10 = inlined_call_operand.vmem [shape: f32[1,50], index: 10, kind: input, shape index: {}]   ;;  %s3811_s11 = inlined_call_operand.vmem [shape: f32[50,10], index: 11, kind: input, shape index: {}]   ;;  %s3812_s12 = inlined_call_operand.vmem [shape: f32[1,10], index: 12, kind: input, shape index: {}]   ;;  %s3813_s13 = inlined_call_operand.hbm [shape: f32[2,1,10], index: 13, kind: output, shape index: {}]  }
   0x1   :  { %20 = vsyncpa [#allocation3 + $0x1], 0  ;;  %s2531_s25 = smov 0   ;;  %s2533_s26 = smov 0  }
   0x2   :  { %s2535_s27 = smov 0   ;;  %s2537_s28 = smov 0  }
   0x3 LB: > { %3817 = sst [smem:[#allocation5_spill]] %s2455_s27  ;;  %s2552_s29 = sadd.s32 4294967295, %s2459_s28   ;;  %s2459_s28 = sphi %s2537_s28, %s3822_s28   ;;  %s2455_s27 = sphi %s2535_s27, %s3824_s27   ;;  %s2451_s26 = sphi %s2533_s26, %s3826_s26   ;;  %s2447_s25 = sphi %s2531_s25, %s3825_s25  }
   0x4   : > { %s2036_s30 = sadd.s32 4294967294, %s2459_s28   ;;  %s2556_s14 = sadd.s32 1, %s2459_s28  }
   0x5   : > { %3818 = sst [smem:[#allocation6_spill]] %s2556_s14  ;;  %s311_s15 = sadd.s32 1, %s2455_s27 }
   0x6   : > { %s308_s16 = ssub.s32 %s2459_s28, %s2556_s14  ;;  %p321_p0 = scmp.ne.s32.totalorder %s2455_s27, %s2451_s26 }
   0x7   : > { %p309_p1 = scmp.eq.s32.totalorder %s308_s16, 0  ;;  %p322_p2 = scmp.eq.s32.totalorder %s2552_s29, 1 }
   0x8   : > { %p327_p3 = scmp.ne.s32.totalorder %s2451_s26, %s2447_s25  ;;  %p328_p4 = scmp.eq.s32.totalorder %s2036_s30, 1 }
   0x9   : > { %s2567_s17 = scalar_select %p309_p1, %s2455_s27, %s311_s15  }
   0xa   : > { %p2569_p5 = por %p322_p2, %p321_p0  ;;  %p2573_p6 = por %p328_p4, %p327_p3 }
   0xb   : > { %3819 = sst [smem:[#allocation7_spill]] %s2567_s17  ;;  %p2039_p7 = scmp.ge.s32.totalorder %s2459_s28, 1 }
   0xc   : > { %p390_p8 = scmp.lt.s32.totalorder %s2459_s28, 3 }
   0xe   : > { %p391_p9 = pnand %p2039_p7, %p390_p8 }
   0xf   : > { %p433_p10 = scmp.lt.s32.totalorder (!%p391_p9), %s2552_s29, 1  ;;  %s431_s21 = sand.u32 (!%p391_p9), 1, %s2451_s26  }
  0x10   : > { %394 = sbr.rel (%p391_p9) target bundleno = 1494 (0x5d6), region = 72  ;;  %s1977_s30 = scalar_lea.hbm (!%p391_p9), %s3813_s13, %s2552_s29 }
  0x11   : > { %s432_s14 = scalar_lea.vmem (!%p391_p9), [#allocation2], %s431_s21  ;;  %s1969_s16 = scalar_lea.sflag (!%p391_p9), [#allocation3], %s431_s21 }
  0x12   : > { %s1979_s15 = sshll.u32 (!%p391_p9), %s432_s14, 4  ;;  %s1980_s15 = int_to_ptr.vmem [resolvable:$true] %s1979_s15 }
  0x15   : > { %v456_v0 = vld [vmem:[%s3801_s1 + $0x30] sm:$0xf]  ;;  %vm468_vm0 = vcmask 1043456   ;;  %v457_v1 = vld [vmem:[%s3801_s1 + $0x38] sm:$0xf]  ;;  %v454_v2 = vld [vmem:[%s3801_s1 + $0x20] sm:$0xff] }
  0x16   : > { %2042 = vmatpush.msk.msra.mxu0 %vm468_vm0, %v456_v0  ;;  %2046 = vmatpush.msk.msra.mxu1 %vm468_vm0, %v457_v1  ;;  %v455_v3 = vld [vmem:[%s3801_s1 + $0x28] sm:$0xff]  ;;  %v2056_v4 = vld [vmem:[%s3801_s1 + $0x70] sm:$0xf]  ;;  %v2057_v5 = vld [vmem:[%s3801_s1 + $0x78] sm:$0xf]  ;;  %s434_s23 = scalar_select %p433_p10, %s2552_s29, 1 }
  0x17   : > { %2058 = vmatpush.msk.msra.mxu2 %vm468_vm0, %v2056_v4  ;;  %2062 = vmatpush.msk.msra.mxu3 %vm468_vm0, %v2057_v5  ;;  %v452_v6 = vld [vmem:[%s3801_s1 + $0x10] sm:$0xff]  ;;  %v453_v7 = vld [vmem:[%s3801_s1 + $0x18] sm:$0xff]  ;;  %v2054_v8 = vld [vmem:[%s3801_s1 + $0x60] sm:$0xff]  ;;  %vm458_vm1 = vcmask 228352   ;;  %vm543_vm2 = vcmask 1046528   ;;  %vm630_vm3 = vcmask 1045504  }
  0x18   : > { %488 = vmatpush.msra.mxu0 %v454_v2  ;;  %514 = vmatpush.msra.mxu1 %v455_v3  ;;  %v2055_v9 = vld [vmem:[%s3801_s1 + $0x68] sm:$0xff]  ;;  %v450_v10 = vld [vmem:[%s3801_s1] sm:$0xff]  ;;  %v2052_v12 = vld [vmem:[%s3801_s1 + $0x50] sm:$0xff]  ;;  %s2353_s17 = sshll.u32 %s434_s23, 5  ;;  %vm717_vm4 = vcmask 1044480   ;;  %vm883_vm5 = vcmask 195584  }
  0x19   : > { %576 = vmatpush.msra.mxu2 %v2054_v8  ;;  %602 = vmatpush.msra.mxu3 %v2055_v9  ;;  %v451_v11 = vld [vmem:[%s3801_s1 + $0x8] sm:$0xff]  ;;  %v2053_v13 = vld [vmem:[%s3801_s1 + $0x58] sm:$0xff]  ;;  %s2630_s22 = scalar_lea.vmem %s3800_s0, %s2353_s17  ;;  %v2050_v14 = vld [vmem:[%s3801_s1 + $0x40] sm:$0xff]  ;;  %vm1025_vm6 = vcmask 916480   ;;  %vm1197_vm7 = vcmask 982016   ;;  %vm1557_vm8 = vcmask 64512  }
  0x1a   : > { %489 = vmatpush.msra.mxu0 %v452_v6  ;;  %515 = vmatpush.msra.mxu1 %v453_v7  ;;  %v2051_v15 = vld [vmem:[%s3801_s1 + $0x48] sm:$0xff]  ;;  %v2072_v16 = vld [vmem:[%s3801_s1 + $0xb0] sm:$0xf]  ;;  %v2642_v17 = vld [vmem:[%s2630_s22] sm:$0xff]  ;;  %vm1668_vm9 = vcmask 261120   ;;  %vm1787_vm10 = vcmask 654336  }
  0x1b   : > { %577 = vmatpush.msra.mxu2 %v2052_v12  ;;  %603 = vmatpush.msra.mxu3 %v2053_v13  ;;  %v2645_v18 = vld [vmem:[%s2630_s22 + $0x8] sm:$0xff]  ;;  %v2073_v19 = vld [vmem:[%s3801_s1 + $0xb8] sm:$0xf]  ;;  %v544_v20 = vrot.slane %v2642_v17, 1  ;;  %v2657_v22 = vld [vmem:[%s2630_s22 + $0x10] sm:$0xff]  ;;  %v631_v49 = vrot.slane %v2642_v17, 2 }
  0x1c   : > { %490 = vmatpush.msra.mxu0 %v450_v10  ;;  %516 = vmatpush.msra.mxu1 %v451_v11  ;;  %v545_v21 = vrot.slane %v2645_v18, 1  ;;  %v2070_v23 = vld [vmem:[%s3801_s1 + $0xa0] sm:$0xff]  ;;  %v2071_v24 = vld [vmem:[%s3801_s1 + $0xa8] sm:$0xff]  ;;  %v2088_v26 = vld [vmem:[%s3801_s1 + $0xf0] sm:$0xf]  ;;  %v547_v30 = vrot.slane %v2657_v22, 1 }
  0x1d   : > { %2043 = vmatmul.msk.f32.vlgmr.msra.gmra.mxu0 %vm458_vm1, %v2642_v17  ;;  %2047 = vmatmul.msk.f32.vlgmr.msra.gmra.mxu1 %vm458_vm1, %v2642_v17  ;;  %v2089_v27 = vld [vmem:[%s3801_s1 + $0xf8] sm:$0xf]  ;;  %v2068_v28 = vld [vmem:[%s3801_s1 + $0x90] sm:$0xff]  ;;  %v2086_v31 = vld [vmem:[%s3801_s1 + $0xe0] sm:$0xff]  ;;  %v632_v50 = vrot.slane %v2645_v18, 2  ;;  %v718_v53 = vrot.slane %v2642_v17, 3 }
  0x1e   : > { %578 = vmatpush.msra.mxu2 %v2050_v14  ;;  %604 = vmatpush.msra.mxu3 %v2051_v15  ;;  %v546_v25 = vsel %vm543_vm2, %v544_v20, %v545_v21  ;;  %v2069_v29 = vld [vmem:[%s3801_s1 + $0x98] sm:$0xff]  ;;  %v2087_v32 = vld [vmem:[%s3801_s1 + $0xe8] sm:$0xff]  ;;  %v2066_v33 = vld [vmem:[%s3801_s1 + $0x80] sm:$0xff]  ;;  %v548_v37 = vsel %vm543_vm2, %v545_v21, %v547_v30  ;;  %v719_v54 = vrot.slane %v2645_v18, 3  ;;  %v634_v57 = vrot.slane %v2657_v22, 2  ;;  %s1981_s23 = sshll.u32 %s1977_s30, 4  ;;  %s1982_s23 = int_to_ptr.hbm [resolvable:$true] %s1981_s23 }
  0x1f   : > { %2074 = vmatpush.msk.msrb.mxu0 %vm468_vm0, %v2072_v16  ;;  %2078 = vmatpush.msk.msrb.mxu1 %vm468_vm0, %v2073_v19  ;;  %v2067_v34 = vld [vmem:[%s3801_s1 + $0x88] sm:$0xff]  ;;  %v2084_v35 = vld [vmem:[%s3801_s1 + $0xd0] sm:$0xff]  ;;  %v2085_v36 = vld [vmem:[%s3801_s1 + $0xd8] sm:$0xff]  ;;  %v633_v55 = vsel %vm630_vm3, %v631_v49, %v632_v50  ;;  %v721_v58 = vrot.slane %v2657_v22, 3  ;;  %v804_v1 = vrot.slane %v2642_v17, 4  ;;  %v805_v2 = vrot.slane %v2645_v18, 4 }
  0x20   : > { %2059 = vmatmul.msk.f32.vlgmr.msra.gmra.mxu2 %vm458_vm1, %v546_v25  ;;  %2063 = vmatmul.msk.f32.vlgmr.msra.gmra.mxu3 %vm458_vm1, %v546_v25  ;;  %v2709_v38 = vld [vmem:[%s2630_s22 + $0x18] sm:$0xf]  ;;  %v2082_v39 = vld [vmem:[%s3801_s1 + $0xc0] sm:$0xff]  ;;  %v2083_v40 = vld [vmem:[%s3801_s1 + $0xc8] sm:$0xff]  ;;  %v720_v56 = vsel %vm717_vm4, %v718_v53, %v719_v54  ;;  %v635_v59 = vsel %vm630_vm3, %v632_v50, %v634_v57  ;;  %v807_v4 = vrot.slane %v2657_v22, 4  ;;  %vm1930_vm11 = vcmask 1041408  }
  0x21   : > { %663 = vmatpush.msrb.mxu0 %v2070_v23  ;;  %689 = vmatpush.msrb.mxu1 %v2071_v24  ;;  %v2104_v41 = vld [vmem:[%s3801_s1 + $0x130] sm:$0xf]  ;;  %v2105_v42 = vld [vmem:[%s3801_s1 + $0x138] sm:$0xf]  ;;  %v549_v43 = vrot.slane %v2709_v38, 1  ;;  %v2102_v44 = vld [vmem:[%s3801_s1 + $0x120] sm:$0xff]  ;;  %v722_v60 = vsel %vm717_vm4, %v719_v54, %v721_v58  ;;  %v806_v3 = vsel %vm468_vm0, %v804_v1, %v805_v2 }
  0x22   : > { %2090 = vmatpush.msk.msrb.mxu2 %vm468_vm0, %v2088_v26  ;;  %2094 = vmatpush.msk.msrb.mxu3 %vm468_vm0, %v2089_v27  ;;  %v2103_v45 = vld [vmem:[%s3801_s1 + $0x128] sm:$0xff]  ;;  %v2100_v46 = vld [vmem:[%s3801_s1 + $0x110] sm:$0xff]  ;;  %v2101_v47 = vld [vmem:[%s3801_s1 + $0x118] sm:$0xff]  ;;  %v636_v61 = vrot.slane %v2709_v38, 2  ;;  %v723_v62 = vrot.slane %v2709_v38, 3  ;;  %v808_v5 = vsel %vm468_vm0, %v805_v2, %v807_v4  ;;  %v809_v6 = vrot.slane %v2709_v38, 4 }
  0x23   : > { %664 = vmatpush.msrb.mxu0 %v2068_v28  ;;  %690 = vmatpush.msrb.mxu1 %v2069_v29  ;;  %v550_v48 = vsel %vm543_vm2, %v547_v30, %v549_v43  ;;  %v2098_v51 = vld [vmem:[%s3801_s1 + $0x100] sm:$0xff]  ;;  %v2099_v52 = vld [vmem:[%s3801_s1 + $0x108] sm:$0xff]  ;;  %v1009_v2 = vld [vmem:[%s3804_s4 + $0x70] sm:$0xff]  ;;  %vm1926_vm12 = vcmask 408576   ;;  %vm1954_vm13 = vcmask 73728   ;;  %s2411_s20 = sshra.s32 %s1982_s23, 4  ;;  %s2412_s20 = int_to_ptr.hbm [resolvable:$true] %s2411_s20 }
  0x24   : > { %750 = vmatpush.msrb.mxu2 %v2086_v31  ;;  %776 = vmatpush.msrb.mxu3 %v2087_v32  ;;  %v637_v63 = vsel %vm630_vm3, %v634_v57, %v636_v61  ;;  %v724_v0 = vsel %vm717_vm4, %v721_v58, %v723_v62  ;;  %v810_v7 = vsel %vm468_vm0, %v807_v4, %v809_v6  ;;  %v442_v32 = vld [vmem:[%s3802_s2] sm:$0x3]  ;;  %v1010_v61 = vld [vmem:[%s3804_s4 + $0x78] sm:$0xff]  ;;  %s2413_s17 = scalar_lea.hbm %s2412_s20, 1  ;;  %s2417_s22 = scalar_lea.hbm %s3813_s13, 2 }
  0x25   : > { %2044 = vmatmul.msk.f32.gmra.mxu0 %vm458_vm1, %v2645_v18  ;;  %2048 = vmatmul.msk.f32.gmra.mxu1 %vm458_vm1, %v2645_v18  ;;  %p2414_p11 = scmp.ne.s32.totalorder %s2412_s20, %s2413_s17  ;;  %p2418_p0 = scmp.lt.s32.totalorder %s2412_s20, %s3813_s13 }
  0x26   : > { %665 = vmatpush.msrb.mxu0 %v2066_v33  ;;  %691 = vmatpush.msrb.mxu1 %v2067_v34  ;;  %v444_v33 = vperm.slane %v442_v32, 0  ;;  %v445_v34 = vperm.slane %v442_v32, 1  ;;  %v1020_v32 = vld [vmem:[%s3804_s4 + $0xc8] sm:$0xff]  ;;  %p2419_p1 = scmp.lt.s32.totalorder %s2417_s22, %s2413_s17 }
  0x27   : > { %751 = vmatpush.msrb.mxu2 %v2084_v35  ;;  %777 = vmatpush.msrb.mxu3 %v2085_v36  ;;  %p2415_p12 = pnand %p2414_p11, %p2569_p5 }
  0x28   : > { %2060 = vmatmul.msk.f32.gmra.mxu2 %vm458_vm1, %v548_v37  ;;  %2064 = vmatmul.msk.f32.gmra.mxu3 %vm458_vm1, %v548_v37  ;;  %p2420_p2 = por %p2419_p1, %p2418_p0 }
  0x29   : > { %752 = vmatpush.msrb.mxu2 %v2082_v39  ;;  %778 = vmatpush.msrb.mxu3 %v2083_v40  ;;  %p2416_p13 = pneg %p2415_p12 }
  0x2a   : > { %2106 = vmatpush.msk.msra.mxu0 %vm468_vm0, %v2104_v41  ;;  %2110 = vmatpush.msk.msra.mxu1 %vm468_vm0, %v2105_v42 }
  0x2b   : > { %p2421_p3 = pnand %p2420_p2, %p2416_p13 }
  0x2c   : > { %836 = vmatpush.msra.mxu0 %v2102_v44  ;;  %862 = vmatpush.msra.mxu1 %v2103_v45 }
  0x2d   : > { %2045 = vmatmul.msk.f32.gmra.mxu0 %vm458_vm1, %v2657_v22  ;;  %2049 = vmatmul.msk.f32.gmra.mxu1 %vm458_vm1, %v2657_v22 }
  0x2e   : > { %837 = vmatpush.msra.mxu0 %v2100_v46  ;;  %863 = vmatpush.msra.mxu1 %v2101_v47 }
  0x30   : > { %2061 = vmatmul.msk.f32.gmra.mxu2 %vm458_vm1, %v550_v48  ;;  %2065 = vmatmul.msk.f32.gmra.mxu3 %vm458_vm1, %v550_v48 }
  0x31   : > { %838 = vmatpush.msra.mxu0 %v2098_v51  ;;  %864 = vmatpush.msra.mxu1 %v2099_v52 }
  0x35   : > { %2075 = vmatmul.msk.f32.vlgmr.msrb.gmra.mxu0 %vm458_vm1, %v633_v55  ;;  %2079 = vmatmul.msk.f32.vlgmr.msrb.gmra.mxu1 %vm458_vm1, %v633_v55 }
  0x36   : > { %1032 = vmatpush.msrb.mxu0 %v1010_v61  ;;  %v2128_v61 = vld [vmem:[%s3804_s4 + $0x100] sm:$0xff] }
  0x38   : > { %2091 = vmatmul.msk.f32.vlgmr.msrb.gmra.mxu2 %vm458_vm1, %v720_v56  ;;  %2095 = vmatmul.msk.f32.vlgmr.msrb.gmra.mxu3 %vm458_vm1, %v720_v56 }
  0x39   : > { %1033 = vmatpush.msrb.mxu0 %v1009_v2  ;;  %v2143_v2 = vld [vmem:[%s3804_s4 + $0x178] sm:$0xff] }
  0x3d   : > { %2076 = vmatmul.msk.f32.gmra.mxu0 %vm458_vm1, %v635_v59  ;;  %2080 = vmatmul.msk.f32.gmra.mxu1 %vm458_vm1, %v635_v59 }
  0x40   : > { %2092 = vmatmul.msk.f32.gmra.mxu2 %vm458_vm1, %v722_v60  ;;  %2096 = vmatmul.msk.f32.gmra.mxu3 %vm458_vm1, %v722_v60 }
  0x45   : > { %2077 = vmatmul.msk.f32.gmra.mxu0 %vm458_vm1, %v637_v63  ;;  %2081 = vmatmul.msk.f32.gmra.mxu1 %vm458_vm1, %v637_v63 }
  0x48   : > { %2093 = vmatmul.msk.f32.gmra.mxu2 %vm458_vm1, %v724_v0  ;;  %2097 = vmatmul.msk.f32.gmra.mxu3 %vm458_vm1, %v724_v0 }
  0x4d   : > { %2107 = vmatmul.msk.f32.vlgmr.msra.gmra.mxu0 %vm458_vm1, %v806_v3  ;;  %2111 = vmatmul.msk.f32.vlgmr.msra.gmra.mxu1 %vm458_vm1, %v806_v3  ;;  %v1024_v3 = vld [vmem:[%s3804_s4 + $0xe8] sm:$0xff] }
  0x4e   : > { %1057 = vmatpush.msrb.mxu1 %v1024_v3  ;;  %v995_v3 = vld [vmem:[%s3804_s4] sm:$0xff] }
  0x55   : > { %2108 = vmatmul.msk.f32.gmra.mxu0 %vm458_vm1, %v808_v5  ;;  %2112 = vmatmul.msk.f32.gmra.mxu1 %vm458_vm1, %v808_v5 }
  0x5d   : > { %2109 = vmatmul.msk.f32.gmra.mxu0 %vm458_vm1, %v810_v7  ;;  %2113 = vmatmul.msk.f32.gmra.mxu1 %vm458_vm1, %v810_v7 }
  0x9a   : > { %v492_v8 = vpop.f32.mrf.mxu0  ;;  %v518_v9 = vpop.f32.mrf.mxu1 }
  0x9b   : > { %v527_v43 = vadd.f32 %v492_v8, %v444_v33  ;;  %v528_v44 = vadd.f32 %v518_v9, %v445_v34  ;;  %v1008_v8 = vld [vmem:[%s3804_s4 + $0x68] sm:$0xff]  ;;  %v1023_v9 = vld [vmem:[%s3804_s4 + $0xe0] sm:$0xff] }
  0x9c   : > { %1058 = vmatpush.msrb.mxu1 %v1023_v9  ;;  %1034 = vmatpush.msrb.mxu0 %v1008_v8  ;;  %v1196_v8 = vld [vmem:[%s3805_s5 + $0xe8] sm:$0xff]  ;;  %v1193_v9 = vld [vmem:[%s3805_s5 + $0xd0] sm:$0xff] }
  0xa2   : > { %v495_v10 = vpop.f32.mrf.mxu0  ;;  %v521_v11 = vpop.f32.mrf.mxu1 }
  0xa3   : > { %v580_v12 = vpop.f32.mrf.mxu2  ;;  %v606_v13 = vpop.f32.mrf.mxu3  ;;  %v529_v39 = vadd.f32 %v495_v10, %v444_v33  ;;  %v530_v40 = vadd.f32 %v521_v11, %v445_v34  ;;  %v1022_v10 = vld [vmem:[%s3804_s4 + $0xd8] sm:$0xff] }
  0xa4   : > { %v615_v51 = vadd.f32 %v580_v12, %v527_v43  ;;  %v616_v52 = vadd.f32 %v606_v13, %v528_v44  ;;  %v881_v13 = vld [vmem:[%s3803_s3] sm:$0xff]  ;;  %1059 = vmatpush.msrb.mxu1 %v1022_v10  ;;  %v1001_v43 = vld [vmem:[%s3804_s4 + $0x30] sm:$0xff]  ;;  %v1194_v10 = vld [vmem:[%s3805_s5 + $0xd8] sm:$0xff] }
  0xa5   : > { %v1017_v44 = vld [vmem:[%s3804_s4 + $0xb0] sm:$0xff] }
  0xaa   : > { %v498_v14 = vpop.f32.mrf.mxu0  ;;  %v524_v15 = vpop.f32.mrf.mxu1 }
  0xab   : > { %v583_v16 = vpop.f32.mrf.mxu2  ;;  %v609_v17 = vpop.f32.mrf.mxu3  ;;  %v531_v37 = vadd.f32 %v498_v14, %v444_v33  ;;  %v532_v38 = vadd.f32 %v524_v15, %v445_v34  ;;  %v1007_v14 = vld [vmem:[%s3804_s4 + $0x60] sm:$0xff]  ;;  %v1021_v15 = vld [vmem:[%s3804_s4 + $0xd0] sm:$0xff]  ;;  %v2135_v33 = vld [vmem:[%s3804_s4 + $0x138] sm:$0xff] }
  0xac   : > { %v617_v47 = vadd.f32 %v583_v16, %v529_v39  ;;  %v618_v48 = vadd.f32 %v609_v17, %v530_v40  ;;  %v1006_v16 = vld [vmem:[%s3804_s4 + $0x58] sm:$0xff]  ;;  %1035 = vmatpush.msrb.mxu0 %v1007_v14  ;;  %1060 = vmatpush.msrb.mxu1 %v1021_v15  ;;  %v2141_v17 = vld [vmem:[%s3804_s4 + $0x168] sm:$0xff]  ;;  %v1189_v15 = vld [vmem:[%s3805_s5 + $0xb0] sm:$0xff] }
  0xad   : > { %v2151_v34 = vld [vmem:[%s3804_s4 + $0x1b8] sm:$0xff] }
  0xae   : > { %1036 = vmatpush.msrb.mxu0 %v1006_v16  ;;  %1061 = vmatpush.msrb.mxu1 %v1020_v32  ;;  %v1002_v39 = vld [vmem:[%s3804_s4 + $0x38] sm:$0xff] }
  0xaf   : > { %v1018_v40 = vld [vmem:[%s3804_s4 + $0xb8] sm:$0xff] }
  0xb0   : > { %v1190_v16 = vld [vmem:[%s3805_s5 + $0xb8] sm:$0xff] }
  0xb2   : > { %v667_v18 = vpop.f32.mrf.mxu0  ;;  %v693_v19 = vpop.f32.mrf.mxu1 }
  0xb3   : > { %v586_v20 = vpop.f32.mrf.mxu2  ;;  %v612_v21 = vpop.f32.mrf.mxu3  ;;  %v702_v57 = vadd.f32 %v667_v18, %v615_v51  ;;  %v703_v58 = vadd.f32 %v693_v19, %v616_v52  ;;  %v2155_v18 = vld [vmem:[%s3804_s4 + $0x1d8] sm:$0xff]  ;;  %v1005_v19 = vld [vmem:[%s3804_s4 + $0x50] sm:$0xff]  ;;  %v999_v51 = vld [vmem:[%s3804_s4 + $0x20] sm:$0xff] }
  0xb4   : > { %v619_v41 = vadd.f32 %v586_v20, %v531_v37  ;;  %v620_v42 = vadd.f32 %v612_v21, %v532_v38  ;;  %v882_v20 = vld [vmem:[%s3803_s3 + $0x8] sm:$0xf]  ;;  %v2140_v21 = vld [vmem:[%s3804_s4 + $0x160] sm:$0xff]  ;;  %1037 = vmatpush.msrb.mxu0 %v1005_v19  ;;  %v2134_v37 = vld [vmem:[%s3804_s4 + $0x130] sm:$0xff] }
  0xb5   : > { %v2150_v38 = vld [vmem:[%s3804_s4 + $0x1b0] sm:$0xff]  ;;  %v1015_v52 = vld [vmem:[%s3804_s4 + $0xa0] sm:$0xff] }
  0xb6   : > { %v2188_v19 = vld [vmem:[%s3805_s5 + $0x1d0] sm:$0xff] }
  0xba   : > { %v670_v22 = vpop.f32.mrf.mxu0  ;;  %v696_v23 = vpop.f32.mrf.mxu1 }
  0xbb   : > { %v754_v24 = vpop.f32.mrf.mxu2  ;;  %v780_v25 = vpop.f32.mrf.mxu3  ;;  %v704_v53 = vadd.f32 %v670_v22, %v617_v47  ;;  %v705_v54 = vadd.f32 %v696_v23, %v618_v48  ;;  %v2154_v22 = vld [vmem:[%s3804_s4 + $0x1d0] sm:$0xff]  ;;  %v2139_v23 = vld [vmem:[%s3804_s4 + $0x158] sm:$0xff]  ;;  %v1000_v47 = vld [vmem:[%s3804_s4 + $0x28] sm:$0xff] }
  0xbc   : > { %v789_v4 = vadd.f32 %v754_v24, %v702_v57  ;;  %v790_v5 = vadd.f32 %v780_v25, %v703_v58  ;;  %v2153_v24 = vld [vmem:[%s3804_s4 + $0x1c8] sm:$0xff]  ;;  %v2138_v25 = vld [vmem:[%s3804_s4 + $0x150] sm:$0xff] }
  0xbd   : > { %v1016_v48 = vld [vmem:[%s3804_s4 + $0xa8] sm:$0xff] }
  0xbe   : > { %v2129_v57 = vld [vmem:[%s3804_s4 + $0x108] sm:$0xff] }
  0xbf   : > { %v2145_v58 = vld [vmem:[%s3804_s4 + $0x188] sm:$0xff] }
  0xc2   : > { %v673_v26 = vpop.f32.mrf.mxu0  ;;  %v699_v27 = vpop.f32.mrf.mxu1 }
  0xc3   : > { %v757_v30 = vpop.f32.mrf.mxu2  ;;  %v783_v31 = vpop.f32.mrf.mxu3  ;;  %v706_v49 = vadd.f32 %v673_v26, %v619_v41  ;;  %v707_v50 = vadd.f32 %v699_v27, %v620_v42  ;;  %v2152_v26 = vld [vmem:[%s3804_s4 + $0x1c0] sm:$0xff]  ;;  %v2137_v27 = vld [vmem:[%s3804_s4 + $0x148] sm:$0xff] }
  0xc4   : > { %v791_v62 = vadd.f32 %v757_v30, %v704_v53  ;;  %v792_v63 = vadd.f32 %v783_v31, %v705_v54  ;;  %v2119_v30 = vld [vmem:[%s3803_s3 + $0x18] sm:$0xf]  ;;  %v1004_v31 = vld [vmem:[%s3804_s4 + $0x48] sm:$0xff]  ;;  %v2130_v53 = vld [vmem:[%s3804_s4 + $0x110] sm:$0xff] }
  0xc5   : > { %1038 = vmatpush.msrb.mxu0 %v1004_v31  ;;  %v2133_v41 = vld [vmem:[%s3804_s4 + $0x128] sm:$0xff]  ;;  %v2146_v54 = vld [vmem:[%s3804_s4 + $0x190] sm:$0xff] }
  0xc6   : > { %v2149_v42 = vld [vmem:[%s3804_s4 + $0x1a8] sm:$0xff] }
  0xca   : > { %v840_v28 = vpop.f32.mrf.mxu0  ;;  %v866_v29 = vpop.f32.mrf.mxu1 }
  0xcb   : > { %v760_v45 = vpop.f32.mrf.mxu2  ;;  %v786_v46 = vpop.f32.mrf.mxu3  ;;  %v875_v11 = vadd.f32 %v840_v28, %v789_v4  ;;  %v876_v12 = vadd.f32 %v866_v29, %v790_v5  ;;  %v2118_v28 = vld [vmem:[%s3803_s3 + $0x10] sm:$0xff]  ;;  %v2136_v29 = vld [vmem:[%s3804_s4 + $0x140] sm:$0xff] }
  0xcc   : > { %v793_v55 = vadd.f32 %v760_v45, %v706_v49  ;;  %v794_v56 = vadd.f32 %v786_v46, %v707_v50  ;;  %v2132_v45 = vld [vmem:[%s3804_s4 + $0x120] sm:$0xff]  ;;  %v2131_v49 = vld [vmem:[%s3804_s4 + $0x118] sm:$0xff]  ;;  %v2126_v5 = vld [vmem:[%s3804_s4 + $0xf0] sm:$0xff] }
  0xcd   : > { %v2148_v46 = vld [vmem:[%s3804_s4 + $0x1a0] sm:$0xff]  ;;  %v2147_v50 = vld [vmem:[%s3804_s4 + $0x198] sm:$0xff] }
  0xce   : > { %v1011_v4 = vld [vmem:[%s3804_s4 + $0x80] sm:$0xff] }
  0xd2   : > { %v843_v35 = vpop.f32.mrf.mxu0  ;;  %v869_v36 = vpop.f32.mrf.mxu1 }
  0xd3   : > { %v877_v6 = vadd.f32 %v843_v35, %v791_v62  ;;  %v878_v7 = vadd.f32 %v869_v36, %v792_v63  ;;  %v1003_v35 = vld [vmem:[%s3804_s4 + $0x40] sm:$0xff]  ;;  %v996_v63 = vld [vmem:[%s3804_s4 + $0x8] sm:$0xff] }
  0xd4   : > { %v1019_v36 = vld [vmem:[%s3804_s4 + $0xc0] sm:$0xff]  ;;  %1039 = vmatpush.msrb.mxu0 %v1003_v35  ;;  %v2180_v35 = vld [vmem:[%s3805_s5 + $0x190] sm:$0xff] }
  0xd5   : > { %1062 = vmatpush.msrb.mxu1 %v1019_v36  ;;  %v2144_v62 = vld [vmem:[%s3804_s4 + $0x180] sm:$0xff]  ;;  %v2181_v36 = vld [vmem:[%s3805_s5 + $0x198] sm:$0xff] }
  0xd6   : > { %1040 = vmatpush.msrb.mxu0 %v1002_v39  ;;  %v2178_v39 = vld [vmem:[%s3805_s5 + $0x180] sm:$0xff] }
  0xd7   : > { %1063 = vmatpush.msrb.mxu1 %v1018_v40  ;;  %v2179_v40 = vld [vmem:[%s3805_s5 + $0x188] sm:$0xff] }
  0xd8   : > { %1041 = vmatpush.msrb.mxu0 %v1001_v43  ;;  %v2176_v43 = vld [vmem:[%s3805_s5 + $0x170] sm:$0xff] }
  0xd9   : > { %1064 = vmatpush.msrb.mxu1 %v1017_v44  ;;  %v2177_v44 = vld [vmem:[%s3805_s5 + $0x178] sm:$0xff] }
  0xda   : > { %v846_v59 = vpop.f32.mrf.mxu0  ;;  %v872_v60 = vpop.f32.mrf.mxu1  ;;  %1042 = vmatpush.msrb.mxu0 %v1000_v47  ;;  %v2174_v47 = vld [vmem:[%s3805_s5 + $0x160] sm:$0xff] }
  0xdb   : > { %v879_v0 = vadd.f32 %v846_v59, %v793_v55  ;;  %v880_v1 = vadd.f32 %v872_v60, %v794_v56  ;;  %1065 = vmatpush.msrb.mxu1 %v1016_v48  ;;  %v998_v55 = vld [vmem:[%s3804_s4 + $0x18] sm:$0xff]  ;;  %v997_v59 = vld [vmem:[%s3804_s4 + $0x10] sm:$0xff]  ;;  %v2175_v48 = vld [vmem:[%s3805_s5 + $0x168] sm:$0xff] }
  0xdc   : > { %1043 = vmatpush.msrb.mxu0 %v999_v51  ;;  %v1014_v56 = vld [vmem:[%s3804_s4 + $0x98] sm:$0xff]  ;;  %v1013_v60 = vld [vmem:[%s3804_s4 + $0x90] sm:$0xff] }
  0xdd   : > { %903 = vmatpush.msra.mxu2 %v879_v0  ;;  %926 = vmatpush.msra.mxu3 %v880_v1 }
  0xde   : > { %1066 = vmatpush.msrb.mxu1 %v1015_v52  ;;  %1044 = vmatpush.msrb.mxu0 %v998_v55  ;;  %v2172_v55 = vld [vmem:[%s3805_s5 + $0x150] sm:$0xff] }
  0xdf   : > { %904 = vmatpush.msra.mxu2 %v877_v6  ;;  %927 = vmatpush.msra.mxu3 %v878_v7 }
  0xe0   : > { %1067 = vmatpush.msrb.mxu1 %v1014_v56  ;;  %1045 = vmatpush.msrb.mxu0 %v997_v59  ;;  %v2173_v56 = vld [vmem:[%s3805_s5 + $0x158] sm:$0xff]  ;;  %v2170_v59 = vld [vmem:[%s3805_s5 + $0x140] sm:$0xff] }
  0xe1   : > { %905 = vmatpush.msra.mxu2 %v875_v11  ;;  %928 = vmatpush.msra.mxu3 %v876_v12 }
  0xe2   : > { %2114 = vmatmul.msk.f32.vlgmr.msra.gmra.mxu2 %vm883_vm5, %v881_v13  ;;  %2116 = vmatmul.msk.f32.vlgmr.msra.gmra.mxu3 %vm883_vm5, %v881_v13 }
  0xe3   : > { %958 = vmatpush.msrb.mxu2 %v879_v0  ;;  %981 = vmatpush.msrb.mxu3 %v880_v1  ;;  %v1012_v0 = vld [vmem:[%s3804_s4 + $0x88] sm:$0xff]  ;;  %v2127_v1 = vld [vmem:[%s3804_s4 + $0xf8] sm:$0xff] }
  0xe4   : > { %1068 = vmatpush.msrb.mxu1 %v1013_v60  ;;  %1046 = vmatpush.msrb.mxu0 %v996_v63  ;;  %v2171_v60 = vld [vmem:[%s3805_s5 + $0x148] sm:$0xff]  ;;  %v2168_v63 = vld [vmem:[%s3805_s5 + $0x130] sm:$0xff] }
  0xe5   : > { %959 = vmatpush.msrb.mxu2 %v877_v6  ;;  %982 = vmatpush.msrb.mxu3 %v878_v7  ;;  %v2142_v6 = vld [vmem:[%s3804_s4 + $0x170] sm:$0xff]  ;;  %v1195_v7 = vld [vmem:[%s3805_s5 + $0xe0] sm:$0xff] }
  0xe6   : > { %1069 = vmatpush.msrb.mxu1 %v1012_v0  ;;  %1047 = vmatpush.msrb.mxu0 %v995_v3  ;;  %v2169_v0 = vld [vmem:[%s3805_s5 + $0x138] sm:$0xff] }
  0xe7   : > { %960 = vmatpush.msrb.mxu2 %v875_v11  ;;  %983 = vmatpush.msrb.mxu3 %v876_v12  ;;  %v1191_v11 = vld [vmem:[%s3805_s5 + $0xc0] sm:$0xff]  ;;  %v1192_v12 = vld [vmem:[%s3805_s5 + $0xc8] sm:$0xff] }
  0xe8   : > { %1070 = vmatpush.msrb.mxu1 %v1011_v4  ;;  %1222 = vmatpush.msra.mxu0 %v1196_v8  ;;  %v2221_v8 = vld [vmem:[%s3805_s5 + $0x2c8] sm:$0xff] }
  0xe9   : > { %1109 = vmatpush.msra.mxu2 %v2141_v17  ;;  %1134 = vmatpush.msra.mxu3 %v2155_v18  ;;  %v1187_v17 = vld [vmem:[%s3805_s5 + $0xa0] sm:$0xff]  ;;  %v1188_v18 = vld [vmem:[%s3805_s5 + $0xa8] sm:$0xff] }
  0xea   : > { %2115 = vmatmul.msk.f32.gmra.mxu2 %vm883_vm5, %v882_v20  ;;  %2117 = vmatmul.msk.f32.gmra.mxu3 %vm883_vm5, %v882_v20  ;;  %v1185_v20 = vld [vmem:[%s3805_s5 + $0x90] sm:$0xff] }
  0xeb   : > { %1110 = vmatpush.msra.mxu2 %v2140_v21  ;;  %1135 = vmatpush.msra.mxu3 %v2154_v22  ;;  %v2189_v21 = vld [vmem:[%s3805_s5 + $0x1d8] sm:$0xff] }
  0xec   : > { %1202 = vmatpush.msra.mxu1 %v1195_v7  ;;  %1223 = vmatpush.msra.mxu0 %v1194_v10  ;;  %v1186_v22 = vld [vmem:[%s3805_s5 + $0x98] sm:$0xff]  ;;  %v2220_v7 = vld [vmem:[%s3805_s5 + $0x2c0] sm:$0xff]  ;;  %v2167_v10 = vld [vmem:[%s3805_s5 + $0x128] sm:$0xff] }
  0xed   : > { %1111 = vmatpush.msra.mxu2 %v2139_v23  ;;  %1136 = vmatpush.msra.mxu3 %v2153_v24  ;;  %v2186_v23 = vld [vmem:[%s3805_s5 + $0x1c0] sm:$0xff]  ;;  %v2187_v24 = vld [vmem:[%s3805_s5 + $0x1c8] sm:$0xff] }
  0xee   : > { %1203 = vmatpush.msra.mxu1 %v1193_v9  ;;  %1224 = vmatpush.msra.mxu0 %v1192_v12  ;;  %v2166_v9 = vld [vmem:[%s3805_s5 + $0x120] sm:$0xff]  ;;  %v2219_v12 = vld [vmem:[%s3805_s5 + $0x2b8] sm:$0xff] }
  0xef   : > { %1112 = vmatpush.msra.mxu2 %v2138_v25  ;;  %1137 = vmatpush.msra.mxu3 %v2152_v26  ;;  %v2184_v25 = vld [vmem:[%s3805_s5 + $0x1b0] sm:$0xff]  ;;  %v2185_v26 = vld [vmem:[%s3805_s5 + $0x1b8] sm:$0xff] }
  0xf0   : > { %1204 = vmatpush.msra.mxu1 %v1191_v11  ;;  %1225 = vmatpush.msra.mxu0 %v1190_v16  ;;  %v2218_v11 = vld [vmem:[%s3805_s5 + $0x2b0] sm:$0xff]  ;;  %v2217_v16 = vld [vmem:[%s3805_s5 + $0x2a8] sm:$0xff] }
  0xf1   : > { %1113 = vmatpush.msra.mxu2 %v2137_v27  ;;  %1138 = vmatpush.msra.mxu3 %v2151_v34  ;;  %v1183_v27 = vld [vmem:[%s3805_s5 + $0x80] sm:$0xff]  ;;  %v1182_v34 = vld [vmem:[%s3805_s5 + $0x78] sm:$0xff] }
  0xf2   : > { %2120 = vmatmul.msk.f32.vlgmr.msrb.gmra.mxu2 %vm883_vm5, %v2118_v28  ;;  %2122 = vmatmul.msk.f32.vlgmr.msrb.gmra.mxu3 %vm883_vm5, %v2118_v28  ;;  %v1184_v28 = vld [vmem:[%s3805_s5 + $0x88] sm:$0xff] }
  0xf3   : > { %1114 = vmatpush.msra.mxu2 %v2136_v29  ;;  %1139 = vmatpush.msra.mxu3 %v2150_v38  ;;  %v2182_v29 = vld [vmem:[%s3805_s5 + $0x1a0] sm:$0xff]  ;;  %v1180_v38 = vld [vmem:[%s3805_s5 + $0x68] sm:$0xff] }
  0xf4   : > { %1205 = vmatpush.msra.mxu1 %v1189_v15  ;;  %1226 = vmatpush.msra.mxu0 %v1188_v18  ;;  %v2216_v15 = vld [vmem:[%s3805_s5 + $0x2a0] sm:$0xff]  ;;  %v2215_v18 = vld [vmem:[%s3805_s5 + $0x298] sm:$0xff] }
  0xf5   : > { %1115 = vmatpush.msra.mxu2 %v2135_v33  ;;  %1140 = vmatpush.msra.mxu3 %v2149_v42  ;;  %v1181_v33 = vld [vmem:[%s3805_s5 + $0x70] sm:$0xff]  ;;  %v1178_v42 = vld [vmem:[%s3805_s5 + $0x58] sm:$0xff] }
  0xf6   : > { %1206 = vmatpush.msra.mxu1 %v1187_v17  ;;  %1227 = vmatpush.msra.mxu0 %v1186_v22  ;;  %v2214_v17 = vld [vmem:[%s3805_s5 + $0x290] sm:$0xff]  ;;  %v2211_v22 = vld [vmem:[%s3805_s5 + $0x278] sm:$0xff] }
  0xf7   : > { %1116 = vmatpush.msra.mxu2 %v2134_v37  ;;  %1141 = vmatpush.msra.mxu3 %v2148_v46  ;;  %v1179_v37 = vld [vmem:[%s3805_s5 + $0x60] sm:$0xff]  ;;  %v1176_v46 = vld [vmem:[%s3805_s5 + $0x48] sm:$0xff] }
  0xf8   : > { %1207 = vmatpush.msra.mxu1 %v1185_v20  ;;  %1228 = vmatpush.msra.mxu0 %v1184_v28  ;;  %v2213_v20 = vld [vmem:[%s3805_s5 + $0x288] sm:$0xff] }
  0xf9   : > { %1117 = vmatpush.msra.mxu2 %v2133_v41  ;;  %1142 = vmatpush.msra.mxu3 %v2147_v50  ;;  %v1177_v41 = vld [vmem:[%s3805_s5 + $0x50] sm:$0xff]  ;;  %v2163_v28 = vld [vmem:[%s3805_s5 + $0x108] sm:$0xff] }
  0xfa   : > { %2121 = vmatmul.msk.f32.gmra.mxu2 %vm883_vm5, %v2119_v30  ;;  %2123 = vmatmul.msk.f32.gmra.mxu3 %vm883_vm5, %v2119_v30  ;;  %v2183_v30 = vld [vmem:[%s3805_s5 + $0x1a8] sm:$0xff] }
  0xfb   : > { %1118 = vmatpush.msra.mxu2 %v2132_v45  ;;  %1143 = vmatpush.msra.mxu3 %v2146_v54  ;;  %v1175_v45 = vld [vmem:[%s3805_s5 + $0x40] sm:$0xff]  ;;  %v1174_v54 = vld [vmem:[%s3805_s5 + $0x38] sm:$0xff] }
  0xfc   : > { %1208 = vmatpush.msra.mxu1 %v1183_v27  ;;  %1229 = vmatpush.msra.mxu0 %v1182_v34  ;;  %v2162_v27 = vld [vmem:[%s3805_s5 + $0x100] sm:$0xff]  ;;  %v2203_v34 = vld [vmem:[%s3805_s5 + $0x238] sm:$0xff] }
  0xfd   : > { %1119 = vmatpush.msra.mxu2 %v2131_v49  ;;  %1144 = vmatpush.msra.mxu3 %v2145_v58  ;;  %v1172_v58 = vld [vmem:[%s3805_s5 + $0x28] sm:$0xff] }
  0xfe   : > { %1209 = vmatpush.msra.mxu1 %v1181_v33  ;;  %1230 = vmatpush.msra.mxu0 %v1180_v38  ;;  %v2202_v33 = vld [vmem:[%s3805_s5 + $0x230] sm:$0xff]  ;;  %v2201_v38 = vld [vmem:[%s3805_s5 + $0x228] sm:$0xff] }
  0xff   : > { %1120 = vmatpush.msra.mxu2 %v2130_v53  ;;  %1145 = vmatpush.msra.mxu3 %v2144_v62  ;;  %v1173_v53 = vld [vmem:[%s3805_s5 + $0x30] sm:$0xff]  ;;  %v1170_v62 = vld [vmem:[%s3805_s5 + $0x18] sm:$0xff] }
 0x100   : > { %1210 = vmatpush.msra.mxu1 %v1179_v37  ;;  %1231 = vmatpush.msra.mxu0 %v1178_v42  ;;  %v2200_v37 = vld [vmem:[%s3805_s5 + $0x220] sm:$0xff]  ;;  %v2199_v42 = vld [vmem:[%s3805_s5 + $0x218] sm:$0xff] }
 0x101   : > { %1121 = vmatpush.msra.mxu2 %v2129_v57  ;;  %1146 = vmatpush.msra.mxu3 %v2143_v2  ;;  %v1171_v57 = vld [vmem:[%s3805_s5 + $0x20] sm:$0xff] }
 0x102   : > { %1211 = vmatpush.msra.mxu1 %v1177_v41  ;;  %1232 = vmatpush.msra.mxu0 %v1176_v46  ;;  %v2198_v41 = vld [vmem:[%s3805_s5 + $0x210] sm:$0xff]  ;;  %v2197_v46 = vld [vmem:[%s3805_s5 + $0x208] sm:$0xff] }
 0x103   : > { %1122 = vmatpush.msra.mxu2 %v2128_v61  ;;  %1147 = vmatpush.msra.mxu3 %v2142_v6  ;;  %v1169_v61 = vld [vmem:[%s3805_s5 + $0x10] sm:$0xff]  ;;  %v1168_v6 = vld [vmem:[%s3805_s5 + $0x8] sm:$0xff] }
 0x104   : > { %1212 = vmatpush.msra.mxu1 %v1175_v45  ;;  %1233 = vmatpush.msra.mxu0 %v1174_v54  ;;  %v2196_v45 = vld [vmem:[%s3805_s5 + $0x200] sm:$0xff]  ;;  %v2193_v54 = vld [vmem:[%s3805_s5 + $0x1e8] sm:$0xff] }
 0x105   : > { %1123 = vmatpush.msra.mxu2 %v2127_v1  ;;  %1281 = vmatpush.msrb.mxu3 %v2188_v19  ;;  %v2212_v19 = vld [vmem:[%s3805_s5 + $0x280] sm:$0xff] }
 0x106   : > { %1213 = vmatpush.msra.mxu1 %v1173_v53  ;;  %1234 = vmatpush.msra.mxu0 %v1172_v58  ;;  %v2192_v53 = vld [vmem:[%s3805_s5 + $0x1e0] sm:$0xff]  ;;  %v2241_v58 = vld [vmem:[%s3805_s5 + $0x358] sm:$0xff] }
 0x107   : > { %1124 = vmatpush.msra.mxu2 %v2126_v5  ;;  %1282 = vmatpush.msrb.mxu3 %v2186_v23  ;;  %v1167_v5 = vld [vmem:[%s3805_s5] sm:$0xff] }
 0x108   : > { %1214 = vmatpush.msra.mxu1 %v1171_v57  ;;  %1235 = vmatpush.msra.mxu0 %v1170_v62  ;;  %v2208_v23 = vld [vmem:[%s3805_s5 + $0x260] sm:$0xff]  ;;  %v2240_v57 = vld [vmem:[%s3805_s5 + $0x350] sm:$0xff]  ;;  %v2237_v62 = vld [vmem:[%s3805_s5 + $0x338] sm:$0xff] }
 0x109   : > { %1301 = vmatpush.msrb.mxu2 %v2189_v21  ;;  %1283 = vmatpush.msrb.mxu3 %v2184_v25  ;;  %v2210_v21 = vld [vmem:[%s3805_s5 + $0x270] sm:$0xff] }
 0x10a   : > { %1215 = vmatpush.msra.mxu1 %v1169_v61  ;;  %1236 = vmatpush.msra.mxu0 %v1168_v6  ;;  %v2206_v25 = vld [vmem:[%s3805_s5 + $0x250] sm:$0xff]  ;;  %v2229_v6 = vld [vmem:[%s3805_s5 + $0x2f8] sm:$0xff] }
 0x10b   : > { %1302 = vmatpush.msrb.mxu2 %v2187_v24  ;;  %1284 = vmatpush.msrb.mxu3 %v2182_v29  ;;  %v2209_v24 = vld [vmem:[%s3805_s5 + $0x268] sm:$0xff]  ;;  %v2204_v29 = vld [vmem:[%s3805_s5 + $0x240] sm:$0xff]  ;;  %v2236_v61 = vld [vmem:[%s3805_s5 + $0x330] sm:$0xff] }
 0x10c   : > { %1216 = vmatpush.msra.mxu1 %v1167_v5  ;;  %v2228_v5 = vld [vmem:[%s3805_s5 + $0x2f0] sm:$0xff] }
 0x10d   : > { %1303 = vmatpush.msrb.mxu2 %v2185_v26  ;;  %1285 = vmatpush.msrb.mxu3 %v2180_v35  ;;  %v2207_v26 = vld [vmem:[%s3805_s5 + $0x258] sm:$0xff]  ;;  %v2252_v35 = vld [vmem:[%s3805_s5 + $0x3b0] sm:$0xff] }
 0x10f   : > { %1304 = vmatpush.msrb.mxu2 %v2183_v30  ;;  %1286 = vmatpush.msrb.mxu3 %v2178_v39  ;;  %v2205_v30 = vld [vmem:[%s3805_s5 + $0x248] sm:$0xff]  ;;  %v2250_v39 = vld [vmem:[%s3805_s5 + $0x3a0] sm:$0xff] }
 0x111   : > { %1305 = vmatpush.msrb.mxu2 %v2181_v36  ;;  %1287 = vmatpush.msrb.mxu3 %v2176_v43  ;;  %v2253_v36 = vld [vmem:[%s3805_s5 + $0x3b8] sm:$0xff]  ;;  %v2248_v43 = vld [vmem:[%s3805_s5 + $0x390] sm:$0xff] }
 0x113   : > { %1306 = vmatpush.msrb.mxu2 %v2179_v40  ;;  %1288 = vmatpush.msrb.mxu3 %v2174_v47  ;;  %v2251_v40 = vld [vmem:[%s3805_s5 + $0x3a8] sm:$0xff]  ;;  %v2246_v47 = vld [vmem:[%s3805_s5 + $0x380] sm:$0xff] }
 0x115   : > { %1307 = vmatpush.msrb.mxu2 %v2177_v44  ;;  %1289 = vmatpush.msrb.mxu3 %v2172_v55  ;;  %v2249_v44 = vld [vmem:[%s3805_s5 + $0x398] sm:$0xff]  ;;  %v2242_v55 = vld [vmem:[%s3805_s5 + $0x360] sm:$0xff] }
 0x117   : > { %1308 = vmatpush.msrb.mxu2 %v2175_v48  ;;  %1290 = vmatpush.msrb.mxu3 %v2170_v59  ;;  %v2247_v48 = vld [vmem:[%s3805_s5 + $0x388] sm:$0xff]  ;;  %v2238_v59 = vld [vmem:[%s3805_s5 + $0x340] sm:$0xff] }
 0x119   : > { %1309 = vmatpush.msrb.mxu2 %v2173_v56  ;;  %1291 = vmatpush.msrb.mxu3 %v2168_v63  ;;  %v2243_v56 = vld [vmem:[%s3805_s5 + $0x368] sm:$0xff]  ;;  %v2234_v63 = vld [vmem:[%s3805_s5 + $0x320] sm:$0xff] }
 0x11b   : > { %1310 = vmatpush.msrb.mxu2 %v2171_v60  ;;  %1292 = vmatpush.msrb.mxu3 %v2166_v9  ;;  %v2239_v60 = vld [vmem:[%s3805_s5 + $0x348] sm:$0xff]  ;;  %v2224_v9 = vld [vmem:[%s3805_s5 + $0x2d0] sm:$0xff] }
 0x11d   : > { %1311 = vmatpush.msrb.mxu2 %v2169_v0  ;;  %v2235_v0 = vld [vmem:[%s3805_s5 + $0x328] sm:$0xff] }
 0x11f   : > { %1312 = vmatpush.msrb.mxu2 %v2167_v10  ;;  %v2225_v10 = vld [vmem:[%s3805_s5 + $0x2d8] sm:$0xff] }
 0x165   : > { %v3013_v13 = vpop.f32.mrf.mxu2  ;;  %v3015_v14 = vpop.f32.mrf.mxu3 }
 0x16d   : > { %v3065_v31 = vpop.f32.mrf.mxu2  ;;  %v3067_v32 = vpop.f32.mrf.mxu3 }
 0x175   : > { %v962_v49 = vpop.f32.mrf.mxu2  ;;  %v985_v50 = vpop.f32.mrf.mxu3 }
 0x176   : > { %v991_v51 = vmax.f32 %v3013_v13, %v962_v49  ;;  %v992_v52 = vmax.f32 %v3015_v14, %v985_v50  ;;  %v2164_v13 = vld [vmem:[%s3805_s5 + $0x110] sm:$0xff]  ;;  %v2165_v14 = vld [vmem:[%s3805_s5 + $0x118] sm:$0xff] }
 0x177   : > { %1293 = vmatpush.msrb.mxu3 %v2164_v13  ;;  %1313 = vmatpush.msrb.mxu2 %v2165_v14  ;;  %v2194_v49 = vld [vmem:[%s3805_s5 + $0x1f0] sm:$0xff]  ;;  %v2195_v50 = vld [vmem:[%s3805_s5 + $0x1f8] sm:$0xff] }
 0x178   : > { %1048 = vmatmul.f32.vlgmr.msrb.gmra.mxu0 %v991_v51  ;;  %2124 = vmatmul.msk.f32.vlgmr.msrb.gmra.mxu1 %vm1025_vm6, %v992_v52 }
 0x179   : > { %1125 = vmatmul.f32.vlgmr.msra.gmra.mxu2 %v991_v51  ;;  %2156 = vmatmul.msk.f32.vlgmr.msra.gmra.mxu3 %vm1025_vm6, %v992_v52  ;;  %v2244_v51 = vld [vmem:[%s3805_s5 + $0x370] sm:$0xff]  ;;  %v2245_v52 = vld [vmem:[%s3805_s5 + $0x378] sm:$0xff] }
 0x17a   : > { %1359 = vmatpush.msrb.mxu1 %v2220_v7  ;;  %1379 = vmatpush.msrb.mxu0 %v2221_v8  ;;  %v2226_v7 = vld [vmem:[%s3805_s5 + $0x2e0] sm:$0xff]  ;;  %v2227_v8 = vld [vmem:[%s3805_s5 + $0x2e8] sm:$0xff] }
 0x17b   : > { %1294 = vmatpush.msrb.mxu3 %v2162_v27  ;;  %1314 = vmatpush.msrb.mxu2 %v2163_v28 }
 0x17c   : > { %1360 = vmatpush.msrb.mxu1 %v2218_v11  ;;  %1380 = vmatpush.msrb.mxu0 %v2219_v12 }
 0x17d   : > { %v965_v1 = vpop.f32.mrf.mxu2  ;;  %v988_v2 = vpop.f32.mrf.mxu3 }
 0x17e   : > { %v993_v3 = vmax.f32 %v3065_v31, %v965_v1  ;;  %v994_v4 = vmax.f32 %v3067_v32, %v988_v2  ;;  %1361 = vmatpush.msrb.mxu1 %v2216_v15  ;;  %1381 = vmatpush.msrb.mxu0 %v2217_v16  ;;  %v2160_v31 = vld [vmem:[%s3805_s5 + $0xf0] sm:$0xff]  ;;  %v2161_v32 = vld [vmem:[%s3805_s5 + $0xf8] sm:$0xff] }
 0x17f   : > { %1295 = vmatpush.msrb.mxu3 %v2160_v31  ;;  %1315 = vmatpush.msrb.mxu2 %v2161_v32  ;;  %v2232_v1 = vld [vmem:[%s3805_s5 + $0x310] sm:$0xff]  ;;  %v2233_v2 = vld [vmem:[%s3805_s5 + $0x318] sm:$0xff] }
 0x180   : > { %1051 = vmatmul.f32.gmra.mxu0 %v993_v3  ;;  %2125 = vmatmul.msk.f32.gmra.mxu1 %vm1025_vm6, %v994_v4  ;;  %v2278_v32 = vld [vmem:[%s3805_s5 + $0x470] sm:$0xff] }
 0x181   : > { %1128 = vmatmul.f32.gmra.mxu2 %v993_v3  ;;  %2157 = vmatmul.msk.f32.gmra.mxu3 %vm1025_vm6, %v994_v4  ;;  %v2230_v3 = vld [vmem:[%s3805_s5 + $0x300] sm:$0xff]  ;;  %v2231_v4 = vld [vmem:[%s3805_s5 + $0x308] sm:$0xff] }
 0x182   : > { %1362 = vmatpush.msrb.mxu1 %v2214_v17  ;;  %1382 = vmatpush.msrb.mxu0 %v2215_v18 }
 0x183   : > { %1437 = vmatpush.msra.mxu3 %v2252_v35  ;;  %1457 = vmatpush.msra.mxu2 %v2253_v36  ;;  %v2276_v35 = vld [vmem:[%s3805_s5 + $0x460] sm:$0xff]  ;;  %v2277_v36 = vld [vmem:[%s3805_s5 + $0x468] sm:$0xff] }
 0x184   : > { %1363 = vmatpush.msrb.mxu1 %v2212_v19  ;;  %1383 = vmatpush.msrb.mxu0 %v2213_v20  ;;  %v2284_v19 = vld [vmem:[%s3805_s5 + $0x4a0] sm:$0xff]  ;;  %v2285_v20 = vld [vmem:[%s3805_s5 + $0x4a8] sm:$0xff] }
 0x185   : > { %1438 = vmatpush.msra.mxu3 %v2250_v39  ;;  %1458 = vmatpush.msra.mxu2 %v2251_v40 }
 0x186   : > { %1364 = vmatpush.msrb.mxu1 %v2210_v21  ;;  %1384 = vmatpush.msrb.mxu0 %v2211_v22 }
 0x187   : > { %1439 = vmatpush.msra.mxu3 %v2248_v43  ;;  %1459 = vmatpush.msra.mxu2 %v2249_v44 }
 0x188   : > { %1365 = vmatpush.msrb.mxu1 %v2208_v23  ;;  %1385 = vmatpush.msrb.mxu0 %v2209_v24  ;;  %v2282_v23 = vld [vmem:[%s3805_s5 + $0x490] sm:$0xff]  ;;  %v2283_v24 = vld [vmem:[%s3805_s5 + $0x498] sm:$0xff] }
 0x189   : > { %1440 = vmatpush.msra.mxu3 %v2246_v47  ;;  %1460 = vmatpush.msra.mxu2 %v2247_v48  ;;  %v2270_v47 = vld [vmem:[%s3805_s5 + $0x430] sm:$0xff]  ;;  %v2271_v48 = vld [vmem:[%s3805_s5 + $0x438] sm:$0xff] }
 0x18a   : > { %1366 = vmatpush.msrb.mxu1 %v2206_v25  ;;  %1386 = vmatpush.msrb.mxu0 %v2207_v26 }
 0x18b   : > { %1441 = vmatpush.msra.mxu3 %v2244_v51  ;;  %1461 = vmatpush.msra.mxu2 %v2245_v52  ;;  %v2266_v52 = vld [vmem:[%s3805_s5 + $0x410] sm:$0xff] }
 0x18c   : > { %1367 = vmatpush.msrb.mxu1 %v2204_v29  ;;  %1387 = vmatpush.msrb.mxu0 %v2205_v30  ;;  %v2280_v29 = vld [vmem:[%s3805_s5 + $0x480] sm:$0xff]  ;;  %v2281_v30 = vld [vmem:[%s3805_s5 + $0x488] sm:$0xff] }
 0x18d   : > { %1442 = vmatpush.msra.mxu3 %v2242_v55  ;;  %1462 = vmatpush.msra.mxu2 %v2243_v56  ;;  %v2264_v55 = vld [vmem:[%s3805_s5 + $0x400] sm:$0xff]  ;;  %v2265_v56 = vld [vmem:[%s3805_s5 + $0x408] sm:$0xff] }
 0x18e   : > { %1368 = vmatpush.msrb.mxu1 %v2202_v33  ;;  %1388 = vmatpush.msrb.mxu0 %v2203_v34  ;;  %v2279_v33 = vld [vmem:[%s3805_s5 + $0x478] sm:$0xff] }
 0x18f   : > { %1443 = vmatpush.msra.mxu3 %v2240_v57  ;;  %1463 = vmatpush.msra.mxu2 %v2241_v58  ;;  %v2262_v58 = vld [vmem:[%s3805_s5 + $0x3f0] sm:$0xff] }
 0x190   : > { %1369 = vmatpush.msrb.mxu1 %v2200_v37  ;;  %1389 = vmatpush.msrb.mxu0 %v2201_v38  ;;  %v2274_v37 = vld [vmem:[%s3805_s5 + $0x450] sm:$0xff]  ;;  %v2275_v38 = vld [vmem:[%s3805_s5 + $0x458] sm:$0xff] }
 0x191   : > { %1444 = vmatpush.msra.mxu3 %v2238_v59  ;;  %1464 = vmatpush.msra.mxu2 %v2239_v60  ;;  %v2263_v59 = vld [vmem:[%s3805_s5 + $0x3f8] sm:$0xff]  ;;  %v2260_v60 = vld [vmem:[%s3805_s5 + $0x3e0] sm:$0xff] }
 0x192   : > { %1370 = vmatpush.msrb.mxu1 %v2198_v41  ;;  %1390 = vmatpush.msrb.mxu0 %v2199_v42 }
 0x193   : > { %1445 = vmatpush.msra.mxu3 %v2236_v61  ;;  %1465 = vmatpush.msra.mxu2 %v2237_v62  ;;  %v2261_v61 = vld [vmem:[%s3805_s5 + $0x3e8] sm:$0xff]  ;;  %v2258_v62 = vld [vmem:[%s3805_s5 + $0x3d0] sm:$0xff] }
 0x194   : > { %1371 = vmatpush.msrb.mxu1 %v2196_v45  ;;  %1391 = vmatpush.msrb.mxu0 %v2197_v46  ;;  %v2272_v45 = vld [vmem:[%s3805_s5 + $0x440] sm:$0xff]  ;;  %v2273_v46 = vld [vmem:[%s3805_s5 + $0x448] sm:$0xff] }
 0x195   : > { %1446 = vmatpush.msra.mxu3 %v2234_v63  ;;  %1466 = vmatpush.msra.mxu2 %v2235_v0  ;;  %v2259_v63 = vld [vmem:[%s3805_s5 + $0x3d8] sm:$0xff] }
 0x196   : > { %1372 = vmatpush.msrb.mxu1 %v2194_v49  ;;  %1392 = vmatpush.msrb.mxu0 %v2195_v50  ;;  %v2268_v49 = vld [vmem:[%s3805_s5 + $0x420] sm:$0xff]  ;;  %v2269_v50 = vld [vmem:[%s3805_s5 + $0x428] sm:$0xff] }
 0x197   : > { %1447 = vmatpush.msra.mxu3 %v2232_v1  ;;  %1467 = vmatpush.msra.mxu2 %v2233_v2  ;;  %v2256_v1 = vld [vmem:[%s3805_s5 + $0x3c0] sm:$0xff]  ;;  %v2257_v2 = vld [vmem:[%s3805_s5 + $0x3c8] sm:$0xff] }
 0x198   : > { %1373 = vmatpush.msrb.mxu1 %v2192_v53  ;;  %1393 = vmatpush.msrb.mxu0 %v2193_v54  ;;  %v2267_v53 = vld [vmem:[%s3805_s5 + $0x418] sm:$0xff] }
 0x199   : > { %1448 = vmatpush.msra.mxu3 %v2230_v3  ;;  %1468 = vmatpush.msra.mxu2 %v2231_v4 }
 0x19b   : > { %1449 = vmatpush.msra.mxu3 %v2228_v5  ;;  %1469 = vmatpush.msra.mxu2 %v2229_v6  ;;  %v1663_v5 = vld [vmem:[%s3808_s8 + $0x78] sm:$0xff] }
 0x19c   : > { %v2309_v6 = vld [vmem:[%s3808_s8 + $0x118] sm:$0xff] }
 0x19d   : > { %1450 = vmatpush.msra.mxu3 %v2226_v7  ;;  %1470 = vmatpush.msra.mxu2 %v2227_v8  ;;  %v1662_v7 = vld [vmem:[%s3808_s8 + $0x70] sm:$0xff] }
 0x19e   : > { %v2308_v8 = vld [vmem:[%s3808_s8 + $0x110] sm:$0xff] }
 0x19f   : > { %1451 = vmatpush.msra.mxu3 %v2224_v9  ;;  %1471 = vmatpush.msra.mxu2 %v2225_v10  ;;  %v1661_v9 = vld [vmem:[%s3808_s8 + $0x68] sm:$0xff] }
 0x1a0   : > { %v2307_v10 = vld [vmem:[%s3808_s8 + $0x108] sm:$0xff] }
 0x1f5   : > { %v1049_v11 = vpop.f32.mrf.mxu0  ;;  %v1072_v12 = vpop.f32.mrf.mxu1 }
 0x1f6   : > { %v1073_v15 = vadd.f32 %v1072_v12, %v1049_v11  ;;  %v1159_v11 = vld [vmem:[%s3806_s6] sm:$0x3] }
 0x1fc   : > { %v1126_v13 = vpop.f32.mrf.mxu2  ;;  %v1149_v14 = vpop.f32.mrf.mxu3 }
 0x1fd   : > { %v1150_v16 = vadd.f32 %v1149_v14, %v1126_v13  ;;  %v1052_v21 = vpop.f32.mrf.mxu0  ;;  %v1075_v22 = vpop.f32.mrf.mxu1  ;;  %v1660_v14 = vld [vmem:[%s3808_s8 + $0x60] sm:$0xff] }
 0x1fe   : > { %v1076_v27 = vadd.f32 %v1075_v22, %v1052_v21  ;;  %v2305_v21 = vld [vmem:[%s3808_s8 + $0xf8] sm:$0xff]  ;;  %v1658_v22 = vld [vmem:[%s3808_s8 + $0x50] sm:$0xff] }
 0x1ff   : > { %v1155_v17 = vmax.f32 %v1073_v15, %v1150_v16  ;;  %v2306_v15 = vld [vmem:[%s3808_s8 + $0x100] sm:$0xff]  ;;  %v1161_v16 = vperm.slane %v1159_v11, 0 }
 0x201   : > { %v3371_v18 = vmax.f32 %v1155_v17, 0.0  ;;  %v1162_v17 = vperm.slane %v1159_v11, 1  ;;  %v1783_v11 = vld [vmem:[%s3809_s9 + $0x30] sm:$0xff] }
 0x203   : > { %2158 = vmatmul.msk.f32.vlgmr.msra.gmra.mxu1 %vm1197_vm7, %v3371_v18  ;;  %2159 = vmatmul.msk.f32.vlgmr.msra.gmra.mxu0 %vm1197_vm7, %v3371_v18  ;;  %v1275_v39 = vrot.slane %v3371_v18, 1  ;;  %v1353_v41 = vrot.slane %v3371_v18, 2  ;;  %v1431_v54 = vrot.slane %v3371_v18, 3  ;;  %v1509_v3 = vrot.slane %v3371_v18, 4 }
 0x204   : > { %1515 = vmatpush.msra.mxu1 %v2284_v19  ;;  %1535 = vmatpush.msra.mxu0 %v2285_v20  ;;  %v1129_v25 = vpop.f32.mrf.mxu2  ;;  %v1152_v26 = vpop.f32.mrf.mxu3  ;;  %v1659_v20 = vld [vmem:[%s3808_s8 + $0x58] sm:$0xff] }
 0x205   : > { %v1153_v28 = vadd.f32 %v1152_v26, %v1129_v25  ;;  %v1657_v26 = vld [vmem:[%s3808_s8 + $0x48] sm:$0xff] }
 0x206   : > { %1516 = vmatpush.msra.mxu1 %v2282_v23  ;;  %1536 = vmatpush.msra.mxu0 %v2283_v24  ;;  %v2304_v23 = vld [vmem:[%s3808_s8 + $0xf0] sm:$0xff] }
 0x207   : > { %v1156_v31 = vmax.f32 %v1076_v27, %v1153_v28  ;;  %v2303_v27 = vld [vmem:[%s3808_s8 + $0xe8] sm:$0xff] }
 0x208   : > { %1517 = vmatpush.msra.mxu1 %v2280_v29  ;;  %1537 = vmatpush.msra.mxu0 %v2281_v30 }
 0x209   : > { %v3401_v34 = vmax.f32 %v1156_v31, 0.0 }
 0x20a   : > { %1518 = vmatpush.msra.mxu1 %v2278_v32  ;;  %1538 = vmatpush.msra.mxu0 %v2279_v33 }
 0x20b   : > { %v1276_v40 = vrot.slane %v3401_v34, 1  ;;  %v1354_v42 = vrot.slane %v3401_v34, 2  ;;  %v1432_v51 = vrot.slane %v3401_v34, 3  ;;  %v1510_v0 = vrot.slane %v3401_v34, 4 }
 0x20c   : > { %1519 = vmatpush.msra.mxu1 %v2276_v35  ;;  %1539 = vmatpush.msra.mxu0 %v2277_v36 }
 0x20d   : > { %v1277_v43 = vsel %vm543_vm2, %v1275_v39, %v1276_v40  ;;  %v1355_v44 = vsel %vm630_vm3, %v1353_v41, %v1354_v42  ;;  %v1433_v57 = vsel %vm717_vm4, %v1431_v54, %v1432_v51  ;;  %v1511_v4 = vsel %vm468_vm0, %v1509_v3, %v1510_v0  ;;  %v1556_v42 = vld [vmem:[%s3807_s7] sm:$0xf]  ;;  %v2313_v51 = vld [vmem:[%s3808_s8 + $0x138] sm:$0xff]  ;;  %v2299_v54 = vld [vmem:[%s3808_s8 + $0xc8] sm:$0xff] }
 0x20e   : > { %1520 = vmatpush.msra.mxu1 %v2274_v37  ;;  %1540 = vmatpush.msra.mxu0 %v2275_v38  ;;  %v1649_v0 = vld [vmem:[%s3808_s8 + $0x8] sm:$0xff] }
 0x20f   : > { %2190 = vmatmul.msk.f32.vlgmr.msrb.gmra.mxu3 %vm1197_vm7, %v1277_v43  ;;  %2191 = vmatmul.msk.f32.vlgmr.msrb.gmra.mxu2 %vm1197_vm7, %v1277_v43  ;;  %v2290_v43 = vld [vmem:[%s3807_s7 + $0x4] sm:$0xf]  ;;  %v2295_v3 = vld [vmem:[%s3808_s8 + $0xa8] sm:$0xff] }
 0x210   : > { %2222 = vmatmul.msk.f32.vlgmr.msrb.gmra.mxu1 %vm1197_vm7, %v1355_v44  ;;  %2223 = vmatmul.msk.f32.vlgmr.msrb.gmra.mxu0 %vm1197_vm7, %v1355_v44  ;;  %v1656_v44 = vld [vmem:[%s3808_s8 + $0x40] sm:$0xff] }
 0x211   : > { %1521 = vmatpush.msra.mxu1 %v2272_v45  ;;  %1541 = vmatpush.msra.mxu0 %v2273_v46  ;;  %v2302_v45 = vld [vmem:[%s3808_s8 + $0xe0] sm:$0xff]  ;;  %v1655_v46 = vld [vmem:[%s3808_s8 + $0x38] sm:$0xff] }
 0x213   : > { %1522 = vmatpush.msra.mxu1 %v2270_v47  ;;  %1542 = vmatpush.msra.mxu0 %v2271_v48  ;;  %v2301_v47 = vld [vmem:[%s3808_s8 + $0xd8] sm:$0xff]  ;;  %v1654_v48 = vld [vmem:[%s3808_s8 + $0x30] sm:$0xff] }
 0x215   : > { %1523 = vmatpush.msra.mxu1 %v2268_v49  ;;  %1543 = vmatpush.msra.mxu0 %v2269_v50  ;;  %v2300_v49 = vld [vmem:[%s3808_s8 + $0xd0] sm:$0xff]  ;;  %v1667_v50 = vld [vmem:[%s3808_s8 + $0x98] sm:$0xff] }
 0x217   : > { %1524 = vmatpush.msra.mxu1 %v2266_v52  ;;  %1544 = vmatpush.msra.mxu0 %v2267_v53  ;;  %v1653_v52 = vld [vmem:[%s3808_s8 + $0x28] sm:$0xff]  ;;  %v1666_v53 = vld [vmem:[%s3808_s8 + $0x90] sm:$0xff] }
 0x218   : > { %2254 = vmatmul.msk.f32.vlgmr.msra.gmra.mxu3 %vm1197_vm7, %v1433_v57  ;;  %2255 = vmatmul.msk.f32.vlgmr.msra.gmra.mxu2 %vm1197_vm7, %v1433_v57  ;;  %v2298_v57 = vld [vmem:[%s3808_s8 + $0xc0] sm:$0xff] }
 0x219   : > { %1525 = vmatpush.msra.mxu1 %v2264_v55  ;;  %1545 = vmatpush.msra.mxu0 %v2265_v56  ;;  %v2312_v55 = vld [vmem:[%s3808_s8 + $0x130] sm:$0xff]  ;;  %v1652_v56 = vld [vmem:[%s3808_s8 + $0x20] sm:$0xff] }
 0x21b   : > { %1526 = vmatpush.msra.mxu1 %v2262_v58  ;;  %1546 = vmatpush.msra.mxu0 %v2263_v59  ;;  %v1651_v58 = vld [vmem:[%s3808_s8 + $0x18] sm:$0xff] }
 0x21c   : > { %v2297_v59 = vld [vmem:[%s3808_s8 + $0xb8] sm:$0xff] }
 0x21d   : > { %1527 = vmatpush.msra.mxu1 %v2260_v60  ;;  %1547 = vmatpush.msra.mxu0 %v2261_v61  ;;  %v1650_v60 = vld [vmem:[%s3808_s8 + $0x10] sm:$0xff] }
 0x21e   : > { %v2296_v61 = vld [vmem:[%s3808_s8 + $0xb0] sm:$0xff] }
 0x21f   : > { %1528 = vmatpush.msra.mxu1 %v2258_v62  ;;  %1548 = vmatpush.msra.mxu0 %v2259_v63  ;;  %v1665_v62 = vld [vmem:[%s3808_s8 + $0x88] sm:$0xff] }
 0x220   : > { %v2311_v63 = vld [vmem:[%s3808_s8 + $0x128] sm:$0xff] }
 0x221   : > { %1529 = vmatpush.msra.mxu1 %v2256_v1  ;;  %1549 = vmatpush.msra.mxu0 %v2257_v2  ;;  %v1664_v1 = vld [vmem:[%s3808_s8 + $0x80] sm:$0xff] }
 0x222   : > { %2286 = vmatmul.msk.f32.vlgmr.msra.gmra.mxu1 %vm1197_vm7, %v1511_v4  ;;  %2287 = vmatmul.msk.f32.vlgmr.msra.gmra.mxu0 %vm1197_vm7, %v1511_v4  ;;  %v2310_v2 = vld [vmem:[%s3808_s8 + $0x120] sm:$0xff] }
 0x223   : > { %1672 = vmatpush.msrb.mxu1 %v1663_v5  ;;  %1733 = vmatpush.msrb.mxu0 %v2309_v6  ;;  %v1648_v4 = vld [vmem:[%s3808_s8] sm:$0xff]  ;;  %v1786_v6 = vld [vmem:[%s3809_s9 + $0x48] sm:$0xff] }
 0x224   : > { %v2294_v5 = vld [vmem:[%s3808_s8 + $0xa0] sm:$0xff] }
 0x225   : > { %1673 = vmatpush.msrb.mxu1 %v1662_v7  ;;  %1734 = vmatpush.msrb.mxu0 %v2308_v8  ;;  %v1785_v7 = vld [vmem:[%s3809_s9 + $0x40] sm:$0xff]  ;;  %v1784_v8 = vld [vmem:[%s3809_s9 + $0x38] sm:$0xff] }
 0x227   : > { %1674 = vmatpush.msrb.mxu1 %v1661_v9  ;;  %1735 = vmatpush.msrb.mxu0 %v2307_v10  ;;  %v2325_v9 = vld [vmem:[%s3809_s9 + $0x98] sm:$0xff]  ;;  %v2324_v10 = vld [vmem:[%s3809_s9 + $0x90] sm:$0xff] }
 0x229   : > { %1675 = vmatpush.msrb.mxu1 %v1660_v14  ;;  %1736 = vmatpush.msrb.mxu0 %v2306_v15  ;;  %v1781_v14 = vld [vmem:[%s3809_s9 + $0x20] sm:$0xff]  ;;  %v1780_v15 = vld [vmem:[%s3809_s9 + $0x18] sm:$0xff] }
 0x22b   : > { %1676 = vmatpush.msrb.mxu1 %v1659_v20  ;;  %1737 = vmatpush.msrb.mxu0 %v2305_v21 }
 0x22d   : > { %1677 = vmatpush.msrb.mxu1 %v1658_v22  ;;  %1738 = vmatpush.msrb.mxu0 %v2304_v23 }
 0x22f   : > { %1678 = vmatpush.msrb.mxu1 %v1657_v26  ;;  %1739 = vmatpush.msrb.mxu0 %v2303_v27  ;;  %v2335_v26 = vld [vmem:[%s3809_s9 + $0xe0] sm:$0xff]  ;;  %v2347_v27 = vld [vmem:[%s3809_s9 + $0x138] sm:$0xff] }
 0x231   : > { %1679 = vmatpush.msrb.mxu1 %v1656_v44  ;;  %1740 = vmatpush.msrb.mxu0 %v2302_v45  ;;  %v2317_v44 = vld [vmem:[%s3809_s9 + $0x58] sm:$0xff] }
 0x232   : > { %v2339_v45 = vld [vmem:[%s3809_s9 + $0xf8] sm:$0xff] }
 0x233   : > { %1680 = vmatpush.msrb.mxu1 %v1655_v46  ;;  %1741 = vmatpush.msrb.mxu0 %v2301_v47  ;;  %v2330_v46 = vld [vmem:[%s3809_s9 + $0xb8] sm:$0xff]  ;;  %v2316_v47 = vld [vmem:[%s3809_s9 + $0x50] sm:$0xff] }
 0x235   : > { %1681 = vmatpush.msrb.mxu1 %v1654_v48  ;;  %1742 = vmatpush.msrb.mxu0 %v2300_v49  ;;  %v2329_v48 = vld [vmem:[%s3809_s9 + $0xb0] sm:$0xff] }
 0x236   : > { %v2338_v49 = vld [vmem:[%s3809_s9 + $0xf0] sm:$0xff] }
 0x237   : > { %1682 = vmatpush.msrb.mxu1 %v1653_v52  ;;  %1743 = vmatpush.msrb.mxu0 %v2299_v54 }
 0x239   : > { %1683 = vmatpush.msrb.mxu1 %v1652_v56  ;;  %1744 = vmatpush.msrb.mxu0 %v2298_v57 }
 0x23b   : > { %1684 = vmatpush.msrb.mxu1 %v1651_v58  ;;  %1745 = vmatpush.msrb.mxu0 %v2297_v59 }
 0x23d   : > { %1685 = vmatpush.msrb.mxu1 %v1650_v60  ;;  %1746 = vmatpush.msrb.mxu0 %v2296_v61 }
 0x23f   : > { %1686 = vmatpush.msrb.mxu1 %v1649_v0  ;;  %1747 = vmatpush.msrb.mxu0 %v2295_v3  ;;  %v1923_v0 = vld [vmem:[%s3811_s11 + $0x28] sm:$0xff]  ;;  %v1920_v3 = vld [vmem:[%s3811_s11 + $0x10] sm:$0xff] }
 0x241   : > { %1687 = vmatpush.msrb.mxu1 %v1648_v4  ;;  %1748 = vmatpush.msrb.mxu0 %v2294_v5  ;;  %v1919_v4 = vld [vmem:[%s3811_s11 + $0x8] sm:$0xff]  ;;  %v1918_v5 = vld [vmem:[%s3811_s11] sm:$0xff] }
 0x243   : > { %1902 = vmatpush.msra.mxu1 %v2347_v27 }
 0x280   : > { %v1218_v12 = vpop.f32.mrf.mxu1  ;;  %v1238_v13 = vpop.f32.mrf.mxu0 }
 0x281   : > { %v1241_v24 = vadd.f32 %v1218_v12, %v1161_v16  ;;  %v1242_v25 = vadd.f32 %v1238_v13, %v1162_v17  ;;  %v2323_v12 = vld [vmem:[%s3809_s9 + $0x88] sm:$0xff]  ;;  %v1779_v16 = vld [vmem:[%s3809_s9 + $0x10] sm:$0xff] }
 0x282   : > { %v1782_v13 = vld [vmem:[%s3809_s9 + $0x28] sm:$0xff] }
 0x283   : > { %v1778_v17 = vld [vmem:[%s3809_s9 + $0x8] sm:$0xff] }
 0x28d   : > { %v1375_v28 = vpop.f32.mrf.mxu1  ;;  %v1395_v29 = vpop.f32.mrf.mxu0 }
 0x292   : > { %v1297_v18 = vpop.f32.mrf.mxu3  ;;  %v1317_v19 = vpop.f32.mrf.mxu2 }
 0x293   : > { %v1320_v30 = vadd.f32 %v1297_v18, %v1241_v24  ;;  %v1321_v31 = vadd.f32 %v1317_v19, %v1242_v25  ;;  %v1777_v18 = vld [vmem:[%s3809_s9] sm:$0xff]  ;;  %v2336_v25 = vld [vmem:[%s3809_s9 + $0xe8] sm:$0xff] }
 0x295   : > { %v1398_v34 = vadd.f32 %v1375_v28, %v1320_v30  ;;  %v1399_v35 = vadd.f32 %v1395_v29, %v1321_v31  ;;  %v2346_v28 = vld [vmem:[%s3809_s9 + $0x130] sm:$0xff]  ;;  %v2345_v29 = vld [vmem:[%s3809_s9 + $0x128] sm:$0xff]  ;;  %v2322_v30 = vld [vmem:[%s3809_s9 + $0x80] sm:$0xff] }
 0x296   : > { %1903 = vmatpush.msra.mxu1 %v2346_v28  ;;  %v2344_v31 = vld [vmem:[%s3809_s9 + $0x120] sm:$0xff] }
 0x298   : > { %1904 = vmatpush.msra.mxu1 %v2345_v29 }
 0x29a   : > { %1905 = vmatpush.msra.mxu1 %v2344_v31 }
 0x29b   : > { %v1453_v32 = vpop.f32.mrf.mxu3  ;;  %v1473_v33 = vpop.f32.mrf.mxu2 }
 0x29c   : > { %v1476_v36 = vadd.f32 %v1453_v32, %v1398_v34  ;;  %v1477_v37 = vadd.f32 %v1473_v33, %v1399_v35  ;;  %v2321_v32 = vld [vmem:[%s3809_s9 + $0x78] sm:$0xff]  ;;  %v2320_v35 = vld [vmem:[%s3809_s9 + $0x70] sm:$0xff] }
 0x29d   : > { %v2343_v33 = vld [vmem:[%s3809_s9 + $0x118] sm:$0xff] }
 0x29e   : > { %1906 = vmatpush.msra.mxu1 %v2343_v33  ;;  %v2334_v34 = vld [vmem:[%s3809_s9 + $0xd8] sm:$0xff] }
 0x29f   : > { %v1531_v38 = vpop.f32.mrf.mxu1  ;;  %v1551_v39 = vpop.f32.mrf.mxu0 }
 0x2a0   : > { %v1554_v40 = vadd.f32 %v1531_v38, %v1476_v36  ;;  %v1555_v41 = vadd.f32 %v1551_v39, %v1477_v37  ;;  %v2342_v36 = vld [vmem:[%s3809_s9 + $0x110] sm:$0xff]  ;;  %v2319_v38 = vld [vmem:[%s3809_s9 + $0x68] sm:$0xff] }
 0x2a1   : > { %v2333_v37 = vld [vmem:[%s3809_s9 + $0xd0] sm:$0xff]  ;;  %1907 = vmatpush.msra.mxu1 %v2342_v36  ;;  %v2341_v39 = vld [vmem:[%s3809_s9 + $0x108] sm:$0xff] }
 0x2a2   : > { %1576 = vmatpush.msrb.mxu3 %v1554_v40  ;;  %1596 = vmatpush.msrb.mxu2 %v1555_v41 }
 0x2a3   : > { %2289 = vmatmul.msk.f32.vlgmr.msrb.gmra.mxu2 %vm1557_vm8, %v1556_v42  ;;  %2288 = vmatmul.msk.f32.vlgmr.msrb.gmra.mxu3 %vm1557_vm8, %v1556_v42  ;;  %v2340_v42 = vld [vmem:[%s3809_s9 + $0x100] sm:$0xff] }
 0x2a4   : > { %1621 = vmatpush.msra.mxu3 %v1554_v40  ;;  %1641 = vmatpush.msra.mxu2 %v1555_v41  ;;  %v2332_v40 = vld [vmem:[%s3809_s9 + $0xc8] sm:$0xff]  ;;  %v2318_v41 = vld [vmem:[%s3809_s9 + $0x60] sm:$0xff] }
 0x2a5   : > { %1908 = vmatpush.msra.mxu1 %v2341_v39 }
 0x2a6   : > { %1704 = vmatpush.msrb.mxu3 %v1667_v50  ;;  %1765 = vmatpush.msrb.mxu2 %v2313_v51  ;;  %v2328_v50 = vld [vmem:[%s3809_s9 + $0xa8] sm:$0xff]  ;;  %v2327_v51 = vld [vmem:[%s3809_s9 + $0xa0] sm:$0xff] }
 0x2a7   : > { %1909 = vmatpush.msra.mxu1 %v2340_v42 }
 0x2a8   : > { %1705 = vmatpush.msrb.mxu3 %v1666_v53  ;;  %1766 = vmatpush.msrb.mxu2 %v2312_v55 }
 0x2a9   : > { %1910 = vmatpush.msra.mxu1 %v2339_v45 }
 0x2aa   : > { %1706 = vmatpush.msrb.mxu3 %v1665_v62  ;;  %1767 = vmatpush.msrb.mxu2 %v2311_v63  ;;  %v1924_v63 = vld [vmem:[%s3811_s11 + $0x30] sm:$0x3] }
 0x2ab   : > { %2292 = vmatmul.msk.f32.vlgmr.msra.gmra.mxu2 %vm1557_vm8, %v2290_v43  ;;  %2291 = vmatmul.msk.f32.vlgmr.msra.gmra.mxu3 %vm1557_vm8, %v2290_v43  ;;  %v2331_v43 = vld [vmem:[%s3809_s9 + $0xc0] sm:$0xff] }
 0x2ac   : > { %1707 = vmatpush.msrb.mxu3 %v1664_v1  ;;  %1768 = vmatpush.msrb.mxu2 %v2310_v2  ;;  %v1922_v1 = vld [vmem:[%s3811_s11 + $0x20] sm:$0xff]  ;;  %v1921_v2 = vld [vmem:[%s3811_s11 + $0x18] sm:$0xff] }
 0x2ad   : > { %1911 = vmatpush.msra.mxu1 %v2338_v49 }
 0x2ae   : > { %1797 = vmatpush.msra.mxu3 %v1786_v6  ;;  %1832 = vmatpush.msra.mxu2 %v2325_v9  ;;  %v1775_v6 = vld [vmem:[%s3810_s10] sm:$0x1] }
 0x2b0   : > { %1798 = vmatpush.msra.mxu3 %v1785_v7  ;;  %1833 = vmatpush.msra.mxu2 %v2324_v10 }
 0x2b2   : > { %1799 = vmatpush.msra.mxu3 %v1784_v8  ;;  %1834 = vmatpush.msra.mxu2 %v2323_v12 }
 0x2b4   : > { %1800 = vmatpush.msra.mxu3 %v1783_v11  ;;  %1835 = vmatpush.msra.mxu2 %v2322_v30 }
 0x2b6   : > { %1801 = vmatpush.msra.mxu3 %v1782_v13  ;;  %1836 = vmatpush.msra.mxu2 %v2321_v32 }
 0x2b8   : > { %1802 = vmatpush.msra.mxu3 %v1781_v14  ;;  %1837 = vmatpush.msra.mxu2 %v2320_v35 }
 0x2ba   : > { %1803 = vmatpush.msra.mxu3 %v1780_v15  ;;  %1838 = vmatpush.msra.mxu2 %v2319_v38 }
 0x2bc   : > { %1804 = vmatpush.msra.mxu3 %v1779_v16  ;;  %1839 = vmatpush.msra.mxu2 %v2318_v41  ;;  %v1925_v16 = vld [vmem:[%s3812_s12] sm:$0x1] }
 0x2be   : > { %1805 = vmatpush.msra.mxu3 %v1778_v17  ;;  %1840 = vmatpush.msra.mxu2 %v2317_v44 }
 0x2c0   : > { %1806 = vmatpush.msra.mxu3 %v1777_v18  ;;  %1841 = vmatpush.msra.mxu2 %v2316_v47 }
 0x326   : > { %v1598_v19 = vpop.f32.mrf.mxu2  ;;  %v1578_v20 = vpop.f32.mrf.mxu3 }
 0x32e   : > { %v1643_v21 = vpop.f32.mrf.mxu2  ;;  %v1623_v23 = vpop.f32.mrf.mxu3 }
 0x32f   : > { %v1647_v22 = vmax.f32 %v1598_v19, %v1643_v21  ;;  %v1646_v24 = vmax.f32 %v1578_v20, %v1623_v23 }
 0x331   : > { %2293 = vmatmul.msk.f32.vlgmr.msrb.gmra.mxu3 %vm1668_vm9, %v1647_v22  ;;  %2314 = vmatmul.msk.f32.vlgmr.msrb.gmra.mxu2 %vm1668_vm9, %v1647_v22 }
 0x332   : > { %1688 = vmatmul.f32.vlgmr.msrb.gmra.mxu1 %v1646_v24  ;;  %1749 = vmatmul.f32.vlgmr.msrb.gmra.mxu0 %v1646_v24 }
 0x333   : > { %1867 = vmatpush.msrb.mxu3 %v2336_v25  ;;  %2349 = vmatpush.msk.msrb.mxu2 %vm1930_vm11, %v1924_v63 }
 0x335   : > { %1868 = vmatpush.msrb.mxu3 %v2335_v26  ;;  %1944 = vmatpush.msrb.mxu2 %v1923_v0 }
 0x337   : > { %1869 = vmatpush.msrb.mxu3 %v2334_v34  ;;  %1945 = vmatpush.msrb.mxu2 %v1922_v1 }
 0x339   : > { %1870 = vmatpush.msrb.mxu3 %v2333_v37  ;;  %1946 = vmatpush.msrb.mxu2 %v1921_v2 }
 0x33b   : > { %1871 = vmatpush.msrb.mxu3 %v2332_v40  ;;  %1947 = vmatpush.msrb.mxu2 %v1920_v3 }
 0x33d   : > { %1872 = vmatpush.msrb.mxu3 %v2331_v43  ;;  %1948 = vmatpush.msrb.mxu2 %v1919_v4 }
 0x33f   : > { %1873 = vmatpush.msrb.mxu3 %v2330_v46  ;;  %1949 = vmatpush.msrb.mxu2 %v1918_v5 }
 0x341   : > { %1874 = vmatpush.msrb.mxu3 %v2329_v48 }
 0x343   : > { %1875 = vmatpush.msrb.mxu3 %v2328_v50 }
 0x345   : > { %1876 = vmatpush.msrb.mxu3 %v2327_v51 }
 0x3af   : > { %v1689_v52 = vpop.f32.mrf.mxu1  ;;  %v1750_v53 = vpop.f32.mrf.mxu0 }
 0x3b4   : > { %v1709_v54 = vpop.f32.mrf.mxu3  ;;  %v1770_v55 = vpop.f32.mrf.mxu2 }
 0x3b5   : > { %v1710_v56 = vadd.f32 %v1709_v54, %v1689_v52  ;;  %v1771_v57 = vadd.f32 %v1770_v55, %v1750_v53 }
 0x3b7   : > { %v1773_v58 = vmax.f32 %v1710_v56, %v1771_v57 }
 0x3b9   : > { %v1774_v59 = vmax.f32 %v1773_v58, 0.0 }
 0x3bb   : > { %v1823_v60 = vrot.slane %v1774_v59, 1  ;;  %v1893_v61 = vrot.slane %v1774_v59, 3  ;;  %2315 = vmatmul.msk.f32.vlgmr.msra.gmra.mxu3 %vm1787_vm10, %v1774_v59  ;;  %v1858_v62 = vrot.slane %v1774_v59, 2 }
 0x3bd   : > { %2326 = vmatmul.msk.f32.vlgmr.msra.gmra.mxu2 %vm1787_vm10, %v1823_v60  ;;  %2348 = vmatmul.msk.f32.vlgmr.msra.gmra.mxu1 %vm1787_vm10, %v1893_v61 }
 0x3c3   : > { %2337 = vmatmul.msk.f32.vlgmr.msrb.gmra.mxu3 %vm1787_vm10, %v1858_v62 }
 0x43a   : > { %v1913_v13 = vpop.f32.mrf.mxu1 }
 0x43e   : > { %v1808_v7 = vpop.f32.mrf.mxu3 }
 0x43f   : > { %v1811_v8 = vadd.f32 %v1808_v7, %v1775_v6 }
 0x440   : > { %v1843_v9 = vpop.f32.mrf.mxu2 }
 0x441   : > { %v1846_v10 = vadd.f32 %v1843_v9, %v1811_v8 }
 0x446   : > { %v1878_v11 = vpop.f32.mrf.mxu3 }
 0x447   : > { %v1881_v12 = vadd.f32 %v1878_v11, %v1846_v10 }
 0x449   : > { %v1916_v14 = vadd.f32 %v1913_v13, %v1881_v12 }
 0x44b   : > { %v1917_v15 = vmax.f32 %v1916_v14, 0.0 }
 0x44d   : > { %2350 = vmatmul.msk.f32.vlgmr.msrb.gmra.mxu2 %vm1926_vm12, %v1917_v15 }
 0x4d0   : > { %v1951_v17 = vpop.f32.mrf.mxu2 }
 0x4d1   : > { %v1952_v18 = vadd.f32 %v1951_v17, %v1925_v16 }
 0x4d3   : > { %v1955_v19 = vsel %vm1954_vm13, %v1952_v18, -inf }
 0x4d4   : > { %1956 = vmax.xlane.f32.xlu0 %v1955_v19 }
 0x547   : > { %v1957_v20 = vpop.xlane.xlu0 %1956 }
 0x548   : > { %v1958_v21 = vsub.f32 %v1952_v18, %v1957_v20 }
 0x54a   : > { %v1959_v22 = vmul.f32 1.442695, %v1958_v21 }
 0x54c   : > { %2393 = vpow2.f32 %v1959_v22 }
 0x552   : > { %v2394_v23 = vpop.eup %2393 }
 0x553   : > { %v1961_v24 = vsel %vm1954_vm13, %v2394_v23, 0.0 }
 0x554   : > { %1962 = vadd.xlane.f32.xlu0 %v1961_v24 }
 0x5c7   : > { %v1963_v25 = vpop.xlane.xlu0 %1962 }
 0x5c8   : > { %2395 = vlog2.f32 %v1963_v25 }
 0x5ce   : > { %v2396_v26 = vpop.eup %2395 }
 0x5cf   : > { %v1965_v27 = vmul.f32 0.6931472, %v2396_v26 }
 0x5d1   : > { %v1966_v28 = vsub.f32 %v1958_v21, %v1965_v27 }
 0x5d3   : > { %1967 = vst.msk [vmem:[%s432_s14] sm:$0x1] %vm1954_vm13, %v1966_v28 }
 0x5d4   : > { %2424 = shalt.err (!%p2421_p3)
}
 0x5d5   : > { %2354 = dma.vmem_to_hbm [thread:$0]  (%p2569_p5), %s1980_s15, 16, %s1982_s23, %s1969_s16  }
 0x5d6 PF: > { %p2360_p4 = scmp.ge.s32.totalorder %s2459_s28, 2  ;;  %s1993_s21 = sand.u32 1, %s2447_s25  }
 0x5d7   : > { %s1994_s14 = scalar_lea.sflag [#allocation3], %s1993_s21 }
 0x5d8   : > { %p2357_p7 = pnand %p2360_p4, %p2573_p6 }
 0x5da   : > { %p2358_p8 = pneg %p2357_p7 }
 0x5dc   : > { %2442 = dma.done.wait (%p2358_p8), %s1994_s14, 16  }
 0x5dd   : > { %2444 = vsyncadd (%p2358_p8), %s1994_s14, 4294967280  ;;  %s3822_s28 = sld [smem:[#allocation6_spill]]  ;;  %s3825_s25 = smov %s2451_s26 }
 0x5de   : > { %s3823_s20 = sld [smem:[#allocation5_spill]] }
 0x5df   : > { %s3824_s27 = sld [smem:[#allocation7_spill]] }
 0x5e3   : > { %p23_p9 = scmp.ge.s32.totalorder %s3822_s28, 4  }
 0x5e4   : > { %s3826_s26 = smov %s3823_s20 }
 0x5e5   :  { %25 = sbr.rel (!%p23_p9) target bundleno = 3 (0x3), region = 122 }
 0x5ea   :  { %1999 = vsyncpa [#allocation3], 1 }
 0x5eb   :  { %2001 = vsyncpa [#allocation3 + $0x1], 1 }

</bundles_post_ra>
